<compile_context>
chip_gen: v6e
topology: v6e:2x2x1
jax: 0.10.0
libtpu: 0.0.40
codegen_flags: <defaults>
</compile_context>

<pallas_src>
import jax
import jax.numpy as jnp
import numpy as np
from jax.experimental import pallas as pl
from jax.experimental.pallas import tpu as pltpu

_LANE = 128


def _round_up(v, m):
    return (v + m - 1) // m * m


def _sublane_mult(itemsize):
    # Rows per vreg (sublane packing) by element width.
    return {4: 8, 2: 16, 1: 32}.get(int(itemsize), 8)


def _vmem_capacity_bytes():
    try:
        return int(pltpu.get_tpu_info().vmem_capacity_bytes)
    except Exception:  # no TPU info available -> assume the tightest generation (v7x)
        return 64 << 20


def _pipeline_budget_bytes():
    # Budget for the steady-state double-buffered (in + out) pipeline blocks.
    # v5e/v6e (128 MiB) and v7x (64 MiB) both land at <= 32 MiB.
    return min(32 << 20, int(_vmem_capacity_bytes() * 0.5))


def _vmem_limit_bytes(per_block_bytes):
    # Explicit scoped-VMEM request: enough for the double-buffered blocks plus
    # headroom, capped well under physical VMEM (leaves Mosaic scratch/semaphore room
    # on v7x's 64 MiB per-TC VMEM).
    cap = int(_vmem_capacity_bytes() * 0.65)
    need = 2 * per_block_bytes + (4 << 20)
    return int(min(cap, max(32 << 20, need)))


def _padded_block_bytes(block_shape, itemsize):
    """VMEM footprint of one pipeline buffer ((sublane,128)-tile padded minor dims)."""
    dims = tuple(int(d) for d in block_shape)
    sub = _sublane_mult(itemsize)
    if len(dims) == 1:
        return _round_up(dims[0], _LANE) * itemsize
    lead = 1
    for d in dims[:-2]:
        lead *= d
    return lead * _round_up(dims[-2], sub) * _round_up(dims[-1], _LANE) * itemsize


def _cost(shape, itemsize):
    nbytes = int(np.prod(shape)) * itemsize
    # Pure data movement: no flops, no transcendentals, one read + one write.
    return pl.CostEstimate(flops=0, transcendentals=0, bytes_accessed=2 * nbytes)


def _device_kind():
    try:
        return jax.devices()[0].device_kind
    except Exception:
        return "unknown"


# ----------------------------- kernels ---------------------------------------


def _nhwc_lane_dense_kernel(x_ref, o_ref):
    # x_ref: (bn, C, tile_hw) -> o_ref: (bn, tile_hw*C).
    # Minor-2D transpose (XLU) then a lane-compacting flatten so stores are full-width
    # `vst` (lane-dense) instead of C-wide masked `vst.msk`.
    # TODO(synk): if v7x bundle dumps show the XLU transpose+relayout on the critical
    # path (HBM there is ~2.3x v6e), fuse the two relayouts into a single pass.
    y = jnp.transpose(x_ref[...], (0, 2, 1))            # (bn, tile_hw, C)
    o_ref[...] = y.reshape(o_ref.shape)


def _nhwc_safe_kernel(x_ref, o_ref):
    # x_ref: (bn, C, tile_hw) -> o_ref: (bn, tile_hw, C). Plain minor-2D transpose;
    # stores are C-minor (masked when C < 128) but this always lowers.
    o_ref[...] = jnp.transpose(x_ref[...], (0, 2, 1))


def _general_kernel(axes):
    def kernel(x_ref, o_ref):
        o_ref[...] = jnp.transpose(x_ref[...], axes)
    return kernel


# ----------------------------- tiling heuristics ------------------------------


def _choose_nhwc_tiles(n, c, hw, itemsize, full_hw=False):
    """Pick (bn, tile_hw) for the NCHW->NHWC fast path.

    Legality (so every block meets the (sublane,128) rule with no remainder):
      * bn divides n and is a multiple of the sublane count, or bn == n
      * tile_hw divides hw and is a multiple of 128, or tile_hw == hw
    Preference: double-buffered in+out within the VMEM budget, per-step blocks in the
    ~2-8 MiB range, >= 8 (even) grid steps, lane tiles >= 512 wide.
    """
    sub = _sublane_mult(itemsize)
    budget = _pipeline_budget_bytes()
    bn_opts = sorted({b for b in range(sub, n + 1, sub) if n % b == 0} | {n})
    if full_hw:
        thw_opts = [hw]
    else:
        thw_opts = sorted({t for t in range(_LANE, hw + 1, _LANE) if hw % t == 0} | {hw})

    best = None
    for bn in bn_opts:
        for thw in thw_opts:
            blk = (_padded_block_bytes((bn, c, thw), itemsize)
                   + _padded_block_bytes((bn, thw * c), itemsize))
            if 2 * blk > budget:
                continue
            steps = (n // bn) * (hw // thw)
            score = 0.0
            lo, hi = 2 << 20, 8 << 20
            if blk < lo:
                score += (lo - blk) / lo
            elif blk > hi:
                score += (blk - hi) / hi
            if steps < 8:
                score += 0.25 * (8 - steps)
            elif steps % 2:
                score += 0.1          # even step counts split cleanly across 2 TCs (v7x)
            if thw < 512 and thw < hw:
                score += 0.5          # narrow lane tiles -> strided input DMA rows < 2 KiB
            cand = (score, -blk, bn, thw)
            if best is None or cand < best:
                best = cand
    if best is None:
        # Nothing fits the budget hint; take the smallest legal block and let the
        # compile probe (with the generation-capped vmem limit) decide.
        return bn_opts[0], thw_opts[0]
    return best[2], best[3]


# ----------------------------- variant builders ------------------------------
# Each builder returns (callable_or_None, family_tag, dedupe_key).


def _make_nhwc_fast(shape, dtype, full_hw=False):
    """(N,C,H,W)->(N,H,W,C); lane-dense loads (C,tile_hw) AND lane-dense flat stores.

    The output is produced as a 2D (N, H*W*C) slab so the out block (bn, tile_hw*C)
    has no size-1 second-minor dim; the final NHWC view is a free wrapper reshape.
    """
    n, c, h, w = shape
    hw = h * w
    itemsize = jnp.dtype(dtype).itemsize
    bn, thw = _choose_nhwc_tiles(n, c, hw, itemsize, full_hw=full_hw)
    in_block, out_block = (bn, c, thw), (bn, thw * c)
    per_block = (_padded_block_bytes(in_block, itemsize)
                 + _padded_block_bytes(out_block, itemsize))

    call = pl.pallas_call(
        _nhwc_lane_dense_kernel,
        out_shape=jax.ShapeDtypeStruct((n, hw * c), dtype),
        grid=(n // bn, hw // thw),
        in_specs=[pl.BlockSpec(in_block, lambda i, j: (i, 0, j))],
        out_specs=pl.BlockSpec(out_block, lambda i, j: (i, j)),
        compiler_params=pltpu.CompilerParams(
            # Batch- and hw-tiles are fully independent: Mosaic may shard whichever
            # axis has more steps across v7x's two TensorCores; no effect on v5e/v6e.
            # TODO(synk): if xprof shows exposed input DMA on v5e/v6e, try
            # pipeline_mode=pl.Buffered(3) on the input BlockSpec (skip on v7x).
            dimension_semantics=("parallel", "parallel"),
            vmem_limit_bytes=_vmem_limit_bytes(per_block)),
        cost_estimate=_cost(shape, itemsize),
    )

    def fn(x):
        # Wrapper reshapes are contiguous views; all data movement is in-kernel.
        return call(x.reshape(n, c, hw)).reshape(n, h, w, c)

    return fn, "nhwc_fast", ("nhwc_fast", bn, thw)


def _make_nhwc_safe(shape, dtype):
    """(N,C,H,W)->(N,H,W,C); lane-dense loads, C-minor stores (always lowers)."""
    n, c, h, w = shape
    hw = h * w
    itemsize = jnp.dtype(dtype).itemsize
    bn, thw = _choose_nhwc_tiles(n, c, hw, itemsize)
    in_block, out_block = (bn, c, thw), (bn, thw, c)
    per_block = (_padded_block_bytes(in_block, itemsize)
                 + _padded_block_bytes(out_block, itemsize))

    call = pl.pallas_call(
        _nhwc_safe_kernel,
        out_shape=jax.ShapeDtypeStruct((n, hw, c), dtype),
        grid=(n // bn, hw // thw),
        in_specs=[pl.BlockSpec(in_block, lambda i, j: (i, 0, j))],
        out_specs=pl.BlockSpec(out_block, lambda i, j: (i, j, 0)),
        compiler_params=pltpu.CompilerParams(
            dimension_semantics=("parallel", "parallel"),
            vmem_limit_bytes=_vmem_limit_bytes(per_block)),
        cost_estimate=_cost(shape, itemsize),
    )

    def fn(x):
        return call(x.reshape(n, c, hw)).reshape(n, h, w, c)

    return fn, "nhwc_safe", ("nhwc_safe", bn, thw)


def _make_general_batched(shape, dtype, axes, bn=None):
    """axes[0] == 0: tile the shared leading axis, transpose each slab in-kernel."""
    ndim = len(shape)
    out_shape = tuple(shape[a] for a in axes)
    n = shape[0]
    itemsize = jnp.dtype(dtype).itemsize
    in_rest, out_rest = shape[1:], out_shape[1:]

    if bn is None:
        budget = _pipeline_budget_bytes()

        def cost(b):
            return 2 * (_padded_block_bytes((b,) + in_rest, itemsize)
                        + _padded_block_bytes((b,) + out_rest, itemsize))

        bn = max(1, min(n, budget // max(1, cost(1))))
        while bn > 1 and (n % bn != 0 or cost(bn) > budget):
            bn -= 1
        bn = max(1, bn)

    in_block, out_block = (bn,) + in_rest, (bn,) + out_rest
    per_block = (_padded_block_bytes(in_block, itemsize)
                 + _padded_block_bytes(out_block, itemsize))
    zeros = (0,) * (ndim - 1)

    call = pl.pallas_call(
        _general_kernel(axes),
        out_shape=jax.ShapeDtypeStruct(out_shape, dtype),
        grid=(n // bn,),
        in_specs=[pl.BlockSpec(in_block, lambda i: (i,) + zeros)],
        out_specs=pl.BlockSpec(out_block, lambda i: (i,) + zeros),
        compiler_params=pltpu.CompilerParams(
            dimension_semantics=("parallel",),
            vmem_limit_bytes=_vmem_limit_bytes(per_block)),
        cost_estimate=_cost(shape, itemsize),
    )
    return (lambda x: call(x)), "general_batched", ("general_batched", bn)


def _make_general_out0_tiled(shape, dtype, axes):
    """Arbitrary permutation: tile along output axis 0 (input axis axes[0])."""
    ndim = len(shape)
    out_shape = tuple(shape[a] for a in axes)
    lead = axes[0]
    n0 = out_shape[0]
    itemsize = jnp.dtype(dtype).itemsize
    in_block = tuple(1 if d == lead else shape[d] for d in range(ndim))
    out_block = (1,) + out_shape[1:]
    per_block = (_padded_block_bytes(in_block, itemsize)
                 + _padded_block_bytes(out_block, itemsize))

    def in_map(i):
        return tuple(i if d == lead else 0 for d in range(ndim))

    def out_map(i):
        return (i,) + (0,) * (ndim - 1)

    call = pl.pallas_call(
        _general_kernel(axes),
        out_shape=jax.ShapeDtypeStruct(out_shape, dtype),
        grid=(n0,),
        in_specs=[pl.BlockSpec(in_block, in_map)],
        out_specs=pl.BlockSpec(out_block, out_map),
        compiler_params=pltpu.CompilerParams(
            dimension_semantics=("parallel",),
            vmem_limit_bytes=_vmem_limit_bytes(per_block)),
        cost_estimate=_cost(shape, itemsize),
    )
    return (lambda x: call(x)), "general_out0_tiled", ("general_out0_tiled",)


def _make_general_whole(shape, dtype, axes):
    """Arbitrary permutation: single whole-array block (small arrays only)."""
    ndim = len(shape)
    out_shape = tuple(shape[a] for a in axes)
    itemsize = jnp.dtype(dtype).itemsize
    per_block = (_padded_block_bytes(shape, itemsize)
                 + _padded_block_bytes(out_shape, itemsize))
    # grid=(1,) has no pipelining: guard the single block against physical VMEM
    # (tightest on v7x: 64 MiB per TensorCore) rather than failing at compile time.
    if per_block > int(_vmem_capacity_bytes() * 0.6):
        return None, "general_whole", ("general_whole",)
    zeros = (0,) * ndim

    call = pl.pallas_call(
        _general_kernel(axes),
        out_shape=jax.ShapeDtypeStruct(out_shape, dtype),
        grid=(1,),
        in_specs=[pl.BlockSpec(shape, lambda i: zeros)],
        out_specs=pl.BlockSpec(out_shape, lambda i: zeros),
        compiler_params=pltpu.CompilerParams(
            dimension_semantics=("arbitrary",),
            vmem_limit_bytes=_vmem_limit_bytes(per_block)),
        cost_estimate=_cost(shape, itemsize),
    )
    return (lambda x: call(x)), "general_whole", ("general_whole",)


# ----------------------------- dispatch ---------------------------------------

# Only lowering / compile / block-constraint errors advance the probe; anything else
# should surface to the caller instead of silently demoting to a slower variant.
_PROBE_ERRORS = tuple(e for e in (
    pltpu.LoweringException,
    getattr(jax.errors, "JaxRuntimeError", None),
    NotImplementedError,
    ValueError,
) if e is not None)

# Variant families already validated bit-exact on a given device kind: later shapes
# only need the compile probe, not a full reference transpose + equality check.
_PROVEN = set()


def _select_impl(x, axes):
    """Build candidate Pallas variants, compile-probe them, return the first winner."""
    shape, dtype = tuple(x.shape), x.dtype
    dev = _device_kind()

    if len(shape) == 4 and axes == (0, 2, 3, 1):
        builders = [
            _make_nhwc_fast(shape, dtype),                  # lane-dense loads AND stores, 2D grid
            _make_nhwc_fast(shape, dtype, full_hw=True),    # flat lane-dense stores, batch-only grid
            _make_nhwc_safe(shape, dtype),                  # C-minor stores (always lowers)
            _make_general_batched(shape, dtype, axes, bn=1),
        ]
    elif axes[0] == 0 and len(shape) >= 2:
        builders = [
            _make_general_batched(shape, dtype, axes),
            _make_general_batched(shape, dtype, axes, bn=1),
        ]
    else:
        builders = [
            _make_general_out0_tiled(shape, dtype, axes),
            _make_general_whole(shape, dtype, axes),
        ]

    ref = None
    seen = set()
    for fn, tag, key in builders:
        if fn is None or key in seen:
            continue
        seen.add(key)
        jitted = jax.jit(fn)
        try:
            out = jax.block_until_ready(jitted(x))
        except _PROBE_ERRORS:
            continue
        if (dev, tag) in _PROVEN:
            return jitted
        if ref is None:
            ref = jnp.transpose(x, axes)      # one-time validation reference
        if bool(jnp.array_equal(out, ref, equal_nan=True)):
            _PROVEN.add((dev, tag))
            return jitted

    # Last-resort safety net: never hard-fail the op (e.g. blocks that cannot fit
    # v7x's 64 MiB VMEM with any tiling above).
    # TODO(synk): add a multi-axis-tiled Pallas path for arbitrary permutations whose
    # single-axis-tiled blocks exceed VMEM, instead of deferring to XLA's transpose.
    return jax.jit(lambda a: jnp.transpose(a, axes))


def make_permute(axes):
    """Returns a callable mirroring torch.Tensor.permute(axes) via Pallas TPU kernels."""
    axes = tuple(int(a) for a in axes)
    impl_cache = {}

    def permute(x):
        ndim = x.ndim
        assert sorted(axes) == list(range(ndim)), "axes must be a permutation of range(ndim)"
        if axes == tuple(range(ndim)):
            return x
        key = (tuple(x.shape), jnp.dtype(x.dtype).name, axes, _device_kind())
        impl = impl_cache.get(key)
        if impl is None:
            impl = _select_impl(x, axes)
            impl_cache[key] = impl
        return impl(x)

    return permute


if __name__ == "__main__":
    key = jax.random.PRNGKey(0)
    # Small NCHW input, consistent with typical conv activations.
    x = jax.random.normal(key, (2, 4, 16, 16), dtype=jnp.float32)

    axes = (0, 2, 3, 1)  # NCHW -> NHWC, mirrors Permute(axes).forward(x)
    permute = make_permute(axes)

    out = jax.block_until_ready(permute(x))

    ref = jnp.transpose(x, axes)
    np.testing.assert_allclose(np.asarray(out), np.asarray(ref), rtol=0, atol=0)
    assert out.shape == tuple(x.shape[a] for a in axes)
    assert out.dtype == x.dtype

    # Second call goes through the cached, already-compiled implementation.
    out2 = jax.block_until_ready(permute(x))
    np.testing.assert_allclose(np.asarray(out2), np.asarray(ref), rtol=0, atol=0)

    print("KERNEL_OK")
</pallas_src>

<mosaic_0001>
module attributes {stable_mosaic.version = 11 : i64} {
  func.func @_nhwc_lane_dense_kernel(%arg0: i32, %arg1: i32, %arg2: memref<2x4x256xf32, #tpu.memory_space<vmem>>, %arg3: memref<2x1024xf32, #tpu.memory_space<vmem>>) attributes {dimension_semantics = [#tpu.dimension_semantics<parallel>, #tpu.dimension_semantics<parallel>], iteration_bounds = array<i64: 1, 1>, scalar_prefetch = 0 : i64, scratch_operands = 0 : i64, tpu.core_type = #tpu.core_type<tc>, window_params = [{transform_indices = @transform_0, window_bounds = array<i64: 2, 4, 256>}, {transform_indices = @transform_1, window_bounds = array<i64: 2, 1024>}]} {
    %c0 = arith.constant 0 : index
    %c0_0 = arith.constant 0 : index
    %c0_1 = arith.constant 0 : index
    %0 = vector.load %arg2[%c0, %c0_0, %c0_1] : memref<2x4x256xf32, #tpu.memory_space<vmem>>, vector<2x4x256xf32>
    %1 = tpu.transpose %0, [0, 2, 1] : vector<2x4x256xf32> -> vector<2x256x4xf32>
    %2 = vector.shape_cast %1 : vector<2x256x4xf32> to vector<2x1024xf32>
    %c0_2 = arith.constant 0 : index
    %c0_3 = arith.constant 0 : index
    %3 = vector.load %arg3[%c0_2, %c0_3] : memref<2x1024xf32, #tpu.memory_space<vmem>>, vector<2x1024xf32>
    tpu.vector_store %arg3[%c0_2, %c0_3], %2 {strides = array<i32>} : memref<2x1024xf32, #tpu.memory_space<vmem>>, vector<2x1024xf32>,
    return
  }
  func.func @transform_0(%arg0: i32, %arg1: i32) -> (i32, i32, i32) {
    %c0_i32 = arith.constant 0 : i32
    %c0_i32_0 = arith.constant 0 : i32
    return %arg0, %c0_i32, %arg1 : i32, i32, i32
  }
  func.func @transform_1(%arg0: i32, %arg1: i32) -> (i32, i32) {
    %c0_i32 = arith.constant 0 : i32
    return %arg0, %arg1 : i32, i32
  }
}

</mosaic_0001>

<bundles_post_ra>
// kernel: fn.1
= control target key start
LH: loop header
LB: loop body
LE: loop exit
PB: predicated region body
PF: predicated region fallthrough
CT: control target
= control target key end

     0   :  { %v3613_v8 = vmov 1983009808   ;;  %v148_v10 = vlaneseq  ;;  %v3614_v18 = vmov 1934713408   ;;  %v3615_v27 = vmov 0.0   ;;  %s3617_s10 = smov 12   ;;  %s5197_s0 = inlined_call_operand.vmem [shape: f32[2,4,256], index: 0, kind: input, shape index: {}]   ;;  %s5198_s1 = inlined_call_operand.vmem [shape: f32[2,1024], index: 1, kind: output, shape index: {}]  }
   0x1   :  { %v9_v0 = vld [vmem:[%s5197_s0 + $0x8] sm:$0xff]  ;;  %v8_v1 = vld [vmem:[%s5197_s0] sm:$0xff]  ;;  %v146_v9 = vunpack.c.l.s4 %v3613_v8  ;;  %v177_v19 = vunpack.c.l.s4 %v3614_v18  ;;  %s3616_s0 = smov 8   ;;  %s3618_s11 = smov 16   ;;  %vm3248_vm0 = vcmask 31744   ;;  %vm3250_vm1 = vcmask 64512  }
   0x2   :  { %80 = vxpose.xlu1.b32.start.end [1/1] (short) %v9_v0, 128  ;;  %16 = vxpose.xlu0.b32.start.end [1/1] (short) %v8_v1, 128  ;;  %v13_v2 = vcombine.high %v9_v0, %v9_v0  ;;  %v12_v3 = vcombine.high %v8_v1, %v8_v1  ;;  %v149_v14 = vshrl.u32 %v148_v10, 7  ;;  %s3619_s12 = smov 4   ;;  %s3620_s13 = smov 20   ;;  %vm3252_vm2 = vcmask 97280  }
   0x3   :  { %v147_v13 = vunpack.c.0.s8 %v146_v9  ;;  %v178_v24 = vunpack.c.0.s8 %v177_v19  ;;  %s3621_s14 = smov 24   ;;  %s3622_s15 = smov 28   ;;  %vm3254_vm3 = vcmask 130048   ;;  %vm3256_vm4 = vcmask 162816  }
   0x4   :  { %s3623_s16 = smov 32   ;;  %s3624_s17 = smov 36   ;;  %vm3258_vm5 = vcmask 195584   ;;  %vm5252_vm6 = vcmask 228352   ;;  %vm5251_vm7 = vcmask 261120   ;;  %vm5254_vm8 = vcmask 293888  }
   0x5   :  { %v3671_v17 = vsub.s32 %v147_v13, %v149_v14  ;;  %v3685_v31 = vsub.s32 %v178_v24, %v149_v14  ;;  %s3625_s18 = smov 40   ;;  %s3626_s19 = smov 44   ;;  %vm5253_vm9 = vcmask 326656   ;;  %vm5230_vm10 = vcmask 359424  }
   0x6   :  { %s3627_s20 = smov 48   ;;  %s3628_s21 = smov 52   ;;  %vm5232_vm11 = vcmask 392192   ;;  %vm5231_vm12 = vcmask 424960   ;;  %vm5234_vm13 = vcmask 457728   ;;  %vm5233_vm14 = vcmask 490496  }
   0x7   :  { %s5236_s22 = smov 56   ;;  %s5228_s23 = smov 60   ;;  %vm5240_vm15 = vcmask 523264  }
   0x8   :  { %s3631_s24 = smov 64   ;;  %s3632_s25 = smov 68  }
   0x9   :  { %s5225_s26 = smov 72   ;;  %s3634_s27 = smov 76  }
   0xa   :  { %s3635_s28 = smov 80   ;;  %s5221_s29 = smov 84  }
   0xb   :  { %s3637_s30 = smov 88   ;;  %s3638_s2 = smov 92  }
   0xc   :  { %s5204_s3 = smov 96   ;;  %s3640_s4 = smov 100  }
   0xd   :  { %s5249_s5 = smov 104   ;;  %s5247_s6 = smov 108  }
   0xe   :  { %s5199_s7 = smov 112   ;;  %s3644_s8 = smov 116  }
   0xf   :  { %s3645_s9 = smov 120  }
  0x3f   :  { %112 = vxpose.xlu1.b32.start.end [1/1] (short) %v13_v2, 128  ;;  %48 = vxpose.xlu0.b32.start.end [1/1] (short) %v12_v3, 128 }
  0x7e   :  { %v96_v4 = vpop.trf.xlu1  ;;  %v32_v5 = vpop.trf.xlu0 }
  0x7f   :  { %v166_v22 = vrot.slane %v96_v4, %v3671_v17  ;;  %v151_v23 = vrot.slane %v32_v5, %v3671_v17  ;;  %v159_v28 = vcombine.high %v96_v4, %v3615_v27  ;;  %v144_v29 = vcombine.high %v32_v5, %v3615_v27 }
  0x81   :  { %v175_v30 = vcombine.high %v151_v23, %v166_v22  ;;  %v173_v34 = vrot.slane %v159_v28, %v3671_v17  ;;  %v158_v35 = vrot.slane %v144_v29, %v3671_v17  ;;  %v174_v37 = vcombine.low %v151_v23, %v166_v22 }
  0x82   :  { %v97_v6 = vpop.trf.xlu1  ;;  %v33_v7 = vpop.trf.xlu0 }
  0x83   :  { %v189_v36 = vrot.slane %v175_v30, %v3685_v31  ;;  %v190_v41 = vcombine.low %v158_v35, %v173_v34  ;;  %v3702_v42 = vrot.slane %v174_v37, %v3685_v31  ;;  %v232_v45 = vrot.slane %v97_v6, %v3671_v17 }
  0x84   :  { %v217_v46 = vrot.slane %v33_v7, %v3671_v17  ;;  %v191_v48 = vcombine.high %v158_v35, %v173_v34  ;;  %v225_v49 = vcombine.high %v97_v6, %v3615_v27  ;;  %v210_v53 = vcombine.high %v33_v7, %v3615_v27 }
  0x85   :  { %v207_v40 = vcombine.high %v189_v36, %v3615_v27  ;;  %v198_v47 = vrot.slane %v190_v41, %v3685_v31  ;;  %v206_v50 = vcombine.high %v3702_v42, %v3615_v27 }
  0x86   :  { %v3663_v11 = vpop.trf.xlu1  ;;  %v3665_v12 = vpop.trf.xlu0  ;;  %v240_v54 = vcombine.low %v217_v46, %v232_v45  ;;  %v205_v56 = vrot.slane %v191_v48, %v3685_v31  ;;  %v239_v57 = vrot.slane %v225_v49, %v3671_v17  ;;  %v224_v60 = vrot.slane %v210_v53, %v3671_v17 }
  0x87   :  { %v208_v55 = vcombine.high %v198_v47, %v3615_v27  ;;  %v241_v61 = vcombine.high %v217_v46, %v232_v45  ;;  %v298_v5 = vrot.slane %v3663_v11, %v3671_v17  ;;  %v283_v8 = vrot.slane %v3665_v12, %v3671_v17 }
  0x88   :  { %v209_v62 = vcombine.high %v205_v56, %v3615_v27  ;;  %v248_v63 = vrot.slane %v240_v54, %v3685_v31  ;;  %v256_v4 = vcombine.low %v224_v60, %v239_v57  ;;  %v257_v13 = vcombine.high %v224_v60, %v239_v57 }
  0x89   :  { %v255_v3 = vrot.slane %v241_v61, %v3685_v31  ;;  %v291_v14 = vcombine.high %v3663_v11, %v3615_v27  ;;  %v276_v22 = vcombine.high %v3665_v12, %v3615_v27  ;;  %v306_v23 = vcombine.low %v283_v8, %v298_v5 }
  0x8a   :  { %v3667_v15 = vpop.trf.xlu1  ;;  %v3669_v16 = vpop.trf.xlu0  ;;  %v272_v2 = vcombine.high %v248_v63, %v3615_v27  ;;  %v264_v10 = vrot.slane %v256_v4, %v3685_v31  ;;  %v271_v28 = vrot.slane %v257_v13, %v3685_v31  ;;  %v307_v12 = vcombine.high %v283_v8, %v298_v5 }
  0x8b   :  { %v273_v9 = vcombine.high %v255_v3, %v3615_v27  ;;  %v305_v11 = vrot.slane %v291_v14, %v3671_v17  ;;  %v290_v34 = vrot.slane %v276_v22, %v3671_v17  ;;  %v342_v61 = vcombine.high %v3669_v16, %v3615_v27 }
  0x8c   :  { %v274_v24 = vcombine.high %v264_v10, %v3615_v27  ;;  %v275_v35 = vcombine.high %v271_v28, %v3615_v27  ;;  %v321_v45 = vrot.slane %v307_v12, %v3685_v31 }
  0x8d   :  { %v322_v46 = vcombine.low %v290_v34, %v305_v11  ;;  %v356_v5 = vrot.slane %v342_v61, %v3671_v17 }
  0x8e   :  { %v3673_v20 = vpop.trf.xlu1  ;;  %v3675_v21 = vpop.trf.xlu0  ;;  %v339_v53 = vcombine.high %v321_v45, %v3615_v27 }
  0x8f   :  { %v330_v54 = vrot.slane %v322_v46, %v3685_v31 }
  0x92   :  { %v3679_v25 = vpop.trf.xlu1  ;;  %v3681_v26 = vpop.trf.xlu0 }
  0x96   :  { %v3687_v32 = vpop.trf.xlu1  ;;  %v3689_v33 = vpop.trf.xlu0 }
  0x99   :  { %2261 = vrot.lane.b32.xlu1 %v189_v36, %s3616_s0  ;;  %v314_v36 = vrot.slane %v306_v23, %v3685_v31 }
  0x9a   :  { %v3695_v38 = vpop.trf.xlu1  ;;  %v3697_v39 = vpop.trf.xlu0 }
  0x9b   :  { %v338_v41 = vcombine.high %v314_v36, %v3615_v27 }
  0x9d   :  { %2265 = vrot.lane.b32.xlu1 %v207_v40, %s3617_s10 }
  0x9e   :  { %v3704_v43 = vpop.trf.xlu1  ;;  %v3706_v44 = vpop.trf.xlu0 }
  0xa1   :  { %2269 = vrot.lane.b32.xlu1 %v198_v47, %s3618_s11  ;;  %v364_v47 = vrot.slane %v3667_v15, %v3671_v17 }
  0xa2   :  { %v3715_v51 = vpop.trf.xlu1  ;;  %v3717_v52 = vpop.trf.xlu0 }
  0xa4   :  { %2257 = vrot.lane.b32.xlu0 %v206_v50, %s3619_s12  ;;  %v349_v50 = vrot.slane %v3669_v16, %v3671_v17 }
  0xa5   :  { %2273 = vrot.lane.b32.xlu1 %v208_v55, %s3620_s13  ;;  %v323_v55 = vcombine.high %v290_v34, %v305_v11 }
  0xa6   :  { %v3725_v58 = vpop.trf.xlu1  ;;  %v3727_v59 = vpop.trf.xlu0  ;;  %v373_v16 = vcombine.high %v349_v50, %v364_v47 }
  0xa8   :  { %2277 = vrot.lane.b32.xlu0 %v205_v56, %s3621_s14  ;;  %v357_v56 = vcombine.high %v3667_v15, %v3615_v27  ;;  %v387_v22 = vrot.slane %v373_v16, %v3685_v31 }
  0xa9   :  { %2281 = vrot.lane.b32.xlu1 %v209_v62, %s3622_s15  ;;  %v372_v62 = vcombine.low %v349_v50, %v364_v47 }
  0xaa   :  { %v3734_v0 = vpop.trf.xlu1  ;;  %v3736_v1 = vpop.trf.xlu0  ;;  %v371_v15 = vrot.slane %v357_v56, %v3671_v17  ;;  %v405_v34 = vcombine.high %v387_v22, %v3615_v27 }
  0xac   :  { %2285 = vrot.lane.b32.xlu0 %v248_v63, %s3623_s16  ;;  %v340_v63 = vcombine.high %v330_v54, %v3615_v27  ;;  %v388_v23 = vcombine.low %v356_v5, %v371_v15 }
  0xad   :  { %2289 = vrot.lane.b32.xlu1 %v272_v2, %s3624_s17  ;;  %v337_v2 = vrot.slane %v323_v55, %v3685_v31 }
  0xae   :  { %v3744_v6 = vpop.trf.xlu1  ;;  %v3746_v7 = vpop.trf.xlu0  ;;  %v396_v12 = vrot.slane %v388_v23, %v3685_v31 }
  0xaf   :  { %v341_v8 = vcombine.high %v337_v2, %v3615_v27 }
  0xb0   :  { %2293 = vrot.lane.b32.xlu0 %v255_v3, %s3625_s18  ;;  %v406_v50 = vcombine.high %v396_v12, %v3615_v27 }
  0xb1   :  { %2297 = vrot.lane.b32.xlu1 %v273_v9, %s3626_s19  ;;  %v380_v9 = vrot.slane %v372_v62, %v3685_v31 }
  0xb2   :  { %v3756_v18 = vpop.trf.xlu1  ;;  %v3758_v19 = vpop.trf.xlu0 }
  0xb3   :  { %v404_v14 = vcombine.high %v380_v9, %v3615_v27 }
  0xb4   :  { %2301 = vrot.lane.b32.xlu0 %v264_v10, %s3627_s20 }
  0xb5   :  { %2305 = vrot.lane.b32.xlu1 %v274_v24, %s3628_s21  ;;  %v430_v24 = vrot.slane %v3673_v20, %v3671_v17 }
  0xb6   :  { %v3767_v29 = vpop.trf.xlu1  ;;  %v3769_v30 = vpop.trf.xlu0 }
  0xb8   :  { %2309 = vrot.lane.b32.xlu0 %v271_v28, %s5236_s22  ;;  %v415_v28 = vrot.slane %v3675_v21, %v3671_v17 }
  0xb9   :  { %2313 = vrot.lane.b32.xlu1 %v275_v35, %s5228_s23  ;;  %v389_v35 = vcombine.high %v356_v5, %v371_v15 }
  0xba   :  { %v3776_v37 = vpop.trf.xlu1  ;;  %v3778_v40 = vpop.trf.xlu0  ;;  %v438_v46 = vcombine.low %v415_v28, %v430_v24  ;;  %v439_v55 = vcombine.high %v415_v28, %v430_v24  ;;  %v489_v28 = vcombine.high %v3679_v25, %v3615_v27 }
  0xbc   :  { %2317 = vrot.lane.b32.xlu0 %v314_v36, %s3631_s24  ;;  %v453_v15 = vrot.slane %v439_v55, %v3685_v31 }
  0xbd   :  { %2321 = vrot.lane.b32.xlu1 %v338_v41, %s3632_s25  ;;  %v423_v41 = vcombine.high %v3673_v20, %v3615_v27 }
  0xbe   :  { %v3786_v48 = vpop.trf.xlu1  ;;  %v3788_v49 = vpop.trf.xlu0 }
  0xc0   :  { %2325 = vrot.lane.b32.xlu0 %v321_v45, %s5225_s26  ;;  %v408_v45 = vcombine.high %v3675_v21, %v3615_v27  ;;  %v3851_v21 = vrot.slane %v438_v46, %v3685_v31 }
  0xc1   :  { %2329 = vrot.lane.b32.xlu1 %v339_v53, %s3634_s27  ;;  %v403_v53 = vrot.slane %v389_v35, %v3685_v31 }
  0xc2   :  { %v3798_v57 = vpop.trf.xlu1  ;;  %v3800_v60 = vpop.trf.xlu0  ;;  %v422_v20 = vrot.slane %v408_v45, %v3671_v17 }
  0xc3   :  { %v407_v62 = vcombine.high %v403_v53, %v3615_v27 }
  0xc4   :  { %2333 = vrot.lane.b32.xlu0 %v330_v54, %s3635_s28  ;;  %v437_v54 = vrot.slane %v423_v41, %v3671_v17 }
  0xc5   :  { %2337 = vrot.lane.b32.xlu1 %v340_v63, %s5221_s29 }
  0xc6   :  { %v3809_v3 = vpop.trf.xlu1  ;;  %v3811_v4 = vpop.trf.xlu0  ;;  %v454_v63 = vcombine.low %v422_v20, %v437_v54 }
  0xc8   :  { %2341 = vrot.lane.b32.xlu0 %v337_v2, %s3637_s30  ;;  %v470_v2 = vcombine.high %v3851_v21, %v3615_v27  ;;  %v462_v23 = vrot.slane %v454_v63, %v3685_v31 }
  0xc9   :  { %2345 = vrot.lane.b32.xlu1 %v341_v8, %s3638_s2  ;;  %v455_v8 = vcombine.high %v422_v20, %v437_v54 }
  0xca   :  { %v3818_v10 = vpop.trf.xlu1  ;;  %v3820_v13 = vpop.trf.xlu0  ;;  %v472_v35 = vcombine.high %v462_v23, %v3615_v27 }
  0xcb   :  { %v469_v41 = vrot.slane %v455_v8, %v3685_v31 }
  0xcc   :  { %2349 = vrot.lane.b32.xlu0 %v380_v9, %s5204_s3  ;;  %v496_v9 = vrot.slane %v3679_v25, %v3671_v17 }
  0xcd   :  { %2353 = vrot.lane.b32.xlu1 %v404_v14, %s3640_s4  ;;  %v481_v14 = vrot.slane %v3681_v26, %v3671_v17 }
  0xce   :  { %v3830_v11 = vpop.trf.xlu1  ;;  %v3835_v36 = vpop.trf.xlu0 }
  0xd0   :  { %2357 = vrot.lane.b32.xlu0 %v387_v22, %s5249_s5  ;;  %v471_v22 = vcombine.high %v453_v15, %v3615_v27 }
  0xd1   :  { %2361 = vrot.lane.b32.xlu1 %v405_v34, %s5247_s6  ;;  %v474_v34 = vcombine.high %v3681_v26, %v3615_v27  ;;  %v473_v26 = vcombine.high %v469_v41, %v3615_v27 }
  0xd2   :  { %v3842_v47 = vpop.trf.xlu1  ;;  %v3853_v56 = vpop.trf.xlu0 }
  0xd3   :  { %v488_v25 = vrot.slane %v474_v34, %v3671_v17  ;;  %v555_v34 = vcombine.high %v3687_v32, %v3615_v27 }
  0xd4   :  { %2365 = vrot.lane.b32.xlu0 %v396_v12, %s5199_s7  ;;  %s3646_s7 = smov 124   ;;  %v504_v12 = vcombine.low %v481_v14, %v496_v9 }
  0xd5   :  { %2369 = vrot.lane.b32.xlu1 %v406_v50, %s3644_s8  ;;  %v503_v50 = vrot.slane %v489_v28, %v3671_v17 }
  0xd6   :  { %v3855_v61 = vpop.trf.xlu1  ;;  %v3866_v16 = vpop.trf.xlu0  ;;  %v512_v54 = vrot.slane %v504_v12, %v3685_v31  ;;  %v540_v12 = vcombine.high %v3689_v33, %v3615_v27 }
  0xd7   :  { %5258 = vst [vmem:[#allocation2_spill] sm:$0xff] %v3855_v61  ;;  %5260 = vst [vmem:[#allocation4_spill] sm:$0xff] %v3866_v16 }
  0xd8   :  { %2373 = vrot.lane.b32.xlu0 %v403_v53, %s3645_s9  ;;  %v505_v53 = vcombine.high %v481_v14, %v496_v9  ;;  %v536_v63 = vcombine.high %v512_v54, %v3615_v27  ;;  %v521_v9 = vcombine.high %v488_v25, %v503_v50  ;;  %v547_v14 = vrot.slane %v3689_v33, %v3671_v17 }
  0xd9   :  { %2377 = vrot.lane.b32.xlu1 %v407_v62, %s3646_s7  ;;  %v520_v62 = vcombine.low %v488_v25, %v503_v50 }
  0xda   :  { %v3863_v5 = vpop.trf.xlu1  ;;  %v3885_v45 = vpop.trf.xlu0  ;;  %v535_v50 = vrot.slane %v521_v9, %v3685_v31 }
  0xdb   :  { %5259 = vst [vmem:[#allocation3_spill] sm:$0xff] %v3863_v5  ;;  %5262 = vst [vmem:[#allocation6_spill] sm:$0xff] %v3885_v45 }
  0xdc   :  { %2381 = vrot.lane.b32.xlu0 %v470_v2, %s3619_s12  ;;  %v519_v2 = vrot.slane %v505_v53, %v3685_v31  ;;  %v539_v33 = vcombine.high %v535_v50, %v3615_v27 }
  0xdd   :  { %2385 = vrot.lane.b32.xlu1 %v453_v15, %s3616_s0  ;;  %v562_v15 = vrot.slane %v3687_v32, %v3671_v17  ;;  %v554_v32 = vrot.slane %v540_v12, %v3671_v17 }
  0xde   :  { %v3875_v24 = vpop.trf.xlu1  ;;  %v3898_v55 = vpop.trf.xlu0 }
  0xdf   :  { %5261 = vst [vmem:[#allocation5_spill] sm:$0xff] %v3875_v24  ;;  %5265 = vst [vmem:[#allocation9_spill] sm:$0xff] %v3898_v55 }
  0xe0   :  { %2389 = vrot.lane.b32.xlu0 %v471_v22, %s3617_s10  ;;  %v537_v22 = vcombine.high %v519_v2, %v3615_v27 }
  0xe1   :  { %2393 = vrot.lane.b32.xlu1 %v462_v23, %s3618_s11  ;;  %v528_v23 = vrot.slane %v520_v62, %v3685_v31 }
  0xe2   :  { %v3887_v46 = vpop.trf.xlu1  ;;  %v3913_v28 = vpop.trf.xlu0 }
  0xe3   :  { %5263 = vst [vmem:[#allocation7_spill] sm:$0xff] %v3887_v46  ;;  %5267 = vst [vmem:[#allocation11_spill] sm:$0xff] %v3913_v28 }
  0xe4   :  { %2397 = vrot.lane.b32.xlu0 %v472_v35, %s3620_s13  ;;  %v570_v35 = vcombine.low %v547_v14, %v562_v15 }
  0xe5   :  { %2401 = vrot.lane.b32.xlu1 %v469_v41, %s3621_s14  ;;  %v538_v41 = vcombine.high %v528_v23, %v3615_v27 }
  0xe6   :  { %v3895_v20 = vpop.trf.xlu1  ;;  %v3926_v53 = vpop.trf.xlu0  ;;  %v578_v62 = vrot.slane %v570_v35, %v3685_v31 }
  0xe7   :  { %5264 = vst [vmem:[#allocation8_spill] sm:$0xff] %v3895_v20  ;;  %5269 = vst [vmem:[#allocation13_spill] sm:$0xff] %v3926_v53 }
  0xe8   :  { %2405 = vrot.lane.b32.xlu0 %v473_v26, %s3622_s15  ;;  %v569_v26 = vrot.slane %v555_v34, %v3671_v17  ;;  %v613_v34 = vrot.slane %v3697_v39, %v3671_v17 }
  0xe9   :  { %2409 = vrot.lane.b32.xlu1 %v512_v54, %s3623_s16  ;;  %v571_v54 = vcombine.high %v547_v14, %v562_v15  ;;  %v628_v14 = vrot.slane %v3695_v38, %v3671_v17 }
  0xea   :  { %v3907_v8 = vpop.trf.xlu1  ;;  %v3937_v9 = vpop.trf.xlu0  ;;  %v587_v15 = vcombine.high %v554_v32, %v569_v26 }
  0xeb   :  { %5266 = vst [vmem:[#allocation10_spill] sm:$0xff] %v3907_v8  ;;  %5271 = vst [vmem:[#allocation15_spill] sm:$0xff] %v3937_v9 }
  0xec   :  { %2413 = vrot.lane.b32.xlu0 %v536_v63, %s3624_s17 }
  0xed   :  { %2417 = vrot.lane.b32.xlu1 %v519_v2, %s3625_s18  ;;  %v586_v2 = vcombine.low %v554_v32, %v569_v26  ;;  %v621_v26 = vcombine.high %v3695_v38, %v3615_v27  ;;  %v606_v32 = vcombine.high %v3697_v39, %v3615_v27 }
  0xee   :  { %v3923_v25 = vpop.trf.xlu1 }
  0xef   :  { %5268 = vst [vmem:[#allocation12_spill] sm:$0xff] %v3923_v25  ;;  %v594_v35 = vrot.slane %v586_v2, %v3685_v31  ;;  %v635_v2 = vrot.slane %v621_v26, %v3671_v17  ;;  %v620_v38 = vrot.slane %v606_v32, %v3671_v17 }
  0xf0   :  { %2421 = vrot.lane.b32.xlu0 %v537_v22, %s3626_s19  ;;  %v602_v22 = vcombine.high %v578_v62, %v3615_v27 }
  0xf1   :  { %2425 = vrot.lane.b32.xlu1 %v528_v23, %s3627_s20  ;;  %v585_v23 = vrot.slane %v571_v54, %v3685_v31  ;;  %v636_v54 = vcombine.low %v613_v34, %v628_v14 }
  0xf2   :  { %v3935_v63 = vpop.trf.xlu1 }
  0xf3   :  { %5270 = vst [vmem:[#allocation14_spill] sm:$0xff] %v3935_v63  ;;  %v603_v12 = vcombine.high %v585_v23, %v3615_v27  ;;  %v644_v9 = vrot.slane %v636_v54, %v3685_v31  ;;  %v653_v54 = vcombine.high %v620_v38, %v635_v2 }
  0xf4   :  { %2429 = vrot.lane.b32.xlu0 %v538_v41, %s3628_s21 }
  0xf5   :  { %2433 = vrot.lane.b32.xlu1 %v535_v50, %s5236_s22  ;;  %v3951_v50 = vpop.trf.xlu0 }
  0xf6   :  { %v3949_v41 = vpop.trf.xlu1  ;;  %5273 = vst [vmem:[#allocation17_spill] sm:$0xff] %v3951_v50 }
  0xf7   :  { %5272 = vst [vmem:[#allocation16_spill] sm:$0xff] %v3949_v41 }
  0xf8   :  { %2437 = vrot.lane.b32.xlu0 %v539_v33, %s5228_s23  ;;  %v604_v33 = vcombine.high %v594_v35, %v3615_v27 }
  0xf9   :  { %2441 = vrot.lane.b32.xlu1 %v578_v62, %s3631_s24  ;;  %v601_v62 = vrot.slane %v587_v15, %v3685_v31  ;;  %v652_v15 = vcombine.low %v620_v38, %v635_v2  ;;  %v667_v38 = vrot.slane %v653_v54, %v3685_v31 }
  0xfb   :  { %v605_v39 = vcombine.high %v601_v62, %v3615_v27 }
  0xfc   :  { %2445 = vrot.lane.b32.xlu0 %v602_v22, %s3632_s25  ;;  %v3964_v22 = vpop.trf.xlu1 }
  0xfd   :  { %2449 = vrot.lane.b32.xlu1 %v585_v23, %s5225_s26  ;;  %5274 = vst [vmem:[#allocation18_spill] sm:$0xff] %v3964_v22  ;;  %v637_v23 = vcombine.high %v613_v34, %v628_v14  ;;  %v679_v14 = vrot.slane %v3706_v44, %v3671_v17 }
  0xff   :  { %v651_v26 = vrot.slane %v637_v23, %v3685_v31  ;;  %v687_v23 = vcombine.high %v3704_v43, %v3615_v27 }
 0x100   :  { %2453 = vrot.lane.b32.xlu0 %v603_v12, %s3634_s27  ;;  %v3967_v12 = vpop.trf.xlu0 }
 0x101   :  { %2457 = vrot.lane.b32.xlu1 %v594_v35, %s3635_s28  ;;  %5275 = vst [vmem:[#allocation19_spill] sm:$0xff] %v3967_v12  ;;  %v668_v35 = vcombine.high %v644_v9, %v3615_v27 }
 0x104   :  { %2461 = vrot.lane.b32.xlu0 %v604_v33, %s5221_s29  ;;  %v694_v33 = vrot.slane %v3704_v43, %v3671_v17  ;;  %v3981_v32 = vpop.trf.xlu0 }
 0x105   :  { %2465 = vrot.lane.b32.xlu1 %v601_v62, %s3637_s30  ;;  %5276 = vst [vmem:[#allocation20_spill] sm:$0xff] %v3981_v32  ;;  %v669_v62 = vcombine.high %v651_v26, %v3615_v27 }
 0x106   :  { %v702_v22 = vcombine.low %v679_v14, %v694_v33 }
 0x108   :  { %2469 = vrot.lane.b32.xlu0 %v605_v39, %s3638_s2  ;;  %v672_v39 = vcombine.high %v3706_v44, %v3615_v27  ;;  %v4002_v44 = vrot.slane %v702_v22, %v3685_v31 }
 0x109   :  { %2473 = vrot.lane.b32.xlu1 %v644_v9, %s5204_s3  ;;  %v660_v9 = vrot.slane %v652_v15, %v3685_v31  ;;  %s5277_s3 = smov 112   ;;  %v701_v15 = vrot.slane %v687_v23, %v3671_v17 }
 0x10a   :  { %v686_v43 = vrot.slane %v672_v39, %v3671_v17  ;;  %v734_v23 = vcombine.high %v4002_v44, %v3615_v27  ;;  %v760_v39 = vrot.slane %v3715_v51, %v3671_v17 }
 0x10b   :  { %v3979_v34 = vpop.permute.xlu1 %2261  ;;  %v670_v2 = vcombine.high %v660_v9, %v3615_v27 }
 0x10c   :  { %2477 = vrot.lane.b32.xlu0 %v668_v35, %s3640_s4  ;;  %v3995_v35 = vpop.trf.xlu0  ;;  %v719_v22 = vcombine.high %v686_v43, %v701_v15 }
 0x10d   :  { %2481 = vrot.lane.b32.xlu1 %v651_v26, %s5249_s5  ;;  %5278 = vst [vmem:[#allocation21_spill] sm:$0xff] %v3995_v35  ;;  %v703_v26 = vcombine.high %v679_v14, %v694_v33  ;;  %v718_v35 = vcombine.low %v686_v43, %v701_v15  ;;  %v753_v15 = vcombine.high %v3715_v51, %v3615_v27 }
 0x10e   :  { %v733_v12 = vrot.slane %v719_v22, %v3685_v31 }
 0x10f   :  { %v3991_v8 = vpop.permute.xlu1 %2265  ;;  %v717_v33 = vrot.slane %v703_v26, %v3685_v31  ;;  %v726_v53 = vrot.slane %v718_v35, %v3685_v31  ;;  %v738_v26 = vcombine.high %v3717_v52, %v3615_v27 }
 0x110   :  { %2485 = vrot.lane.b32.xlu0 %v669_v62, %s5247_s6 }
 0x111   :  { %2489 = vrot.lane.b32.xlu1 %v660_v9, %s5277_s3  ;;  %v671_v9 = vcombine.high %v667_v38, %v3615_v27  ;;  %v735_v41 = vcombine.high %v717_v33, %v3615_v27  ;;  %v736_v20 = vcombine.high %v726_v53, %v3615_v27  ;;  %v752_v51 = vrot.slane %v738_v26, %v3671_v17 }
 0x113   :  { %v4004_v32 = vpop.permute.xlu1 %2269 }
 0x114   :  { %2493 = vrot.lane.b32.xlu0 %v670_v2, %s3644_s8  ;;  %v745_v2 = vrot.slane %v3717_v52, %v3671_v17  ;;  %v737_v52 = vcombine.high %v733_v12, %v3615_v27 }
 0x115   :  { %2497 = vrot.lane.b32.xlu1 %v667_v38, %s3645_s9 }
 0x116   :  { %v4008_v62 = vpop.permute.xlu0 %2257 }
 0x117   :  { %v4011_v54 = vpop.permute.xlu1 %2273 }
 0x118   :  { %2501 = vrot.lane.b32.xlu0 %v671_v9, %s3646_s7  ;;  %v768_v9 = vcombine.low %v745_v2, %v760_v39 }
 0x119   :  { %2505 = vrot.lane.b32.xlu1 %v734_v23, %s3619_s12 }
 0x11a   :  { %v4018_v14 = vpop.permute.xlu0 %2277  ;;  %v776_v50 = vrot.slane %v768_v9, %v3685_v31  ;;  %v811_v9 = vrot.slane %v3727_v59, %v3671_v17 }
 0x11b   :  { %v4024_v38 = vpop.permute.xlu1 %2281 }
 0x11c   :  { %2509 = vrot.lane.b32.xlu0 %v717_v33, %s3616_s0  ;;  %v769_v33 = vcombine.high %v745_v2, %v760_v39  ;;  %v826_v39 = vrot.slane %v3725_v58, %v3671_v17 }
 0x11d   :  { %2513 = vrot.lane.b32.xlu1 %v735_v41, %s3617_s10  ;;  %v767_v41 = vrot.slane %v753_v15, %v3671_v17  ;;  %v800_v15 = vcombine.high %v776_v50, %v3615_v27 }
 0x11e   :  { %v4032_v43 = vpop.permute.xlu0 %2285  ;;  %v783_v26 = vrot.slane %v769_v33, %v3685_v31 }
 0x11f   :  { %v4036_v23 = vpop.permute.xlu1 %2289 }
 0x120   :  { %2517 = vrot.lane.b32.xlu0 %v726_v53, %s3618_s11  ;;  %v801_v25 = vcombine.high %v783_v26, %v3615_v27 }
 0x121   :  { %2521 = vrot.lane.b32.xlu1 %v736_v20, %s3620_s13  ;;  %v784_v20 = vcombine.low %v752_v51, %v767_v41 }
 0x122   :  { %v4043_v35 = vpop.permute.xlu0 %2293 }
 0x123   :  { %v4046_v63 = vpop.permute.xlu1 %2297  ;;  %v792_v28 = vrot.slane %v784_v20, %v3685_v31 }
 0x124   :  { %2525 = vrot.lane.b32.xlu0 %v733_v12, %s3621_s14  ;;  %v785_v12 = vcombine.high %v752_v51, %v767_v41  ;;  %v804_v41 = vcombine.high %v3727_v59, %v3615_v27  ;;  %v834_v51 = vcombine.low %v811_v9, %v826_v39 }
 0x125   :  { %2529 = vrot.lane.b32.xlu1 %v737_v52, %s3622_s15  ;;  %v802_v46 = vcombine.high %v792_v28, %v3615_v27 }
 0x126   :  { %v4052_v53 = vpop.permute.xlu0 %2301  ;;  %v799_v55 = vrot.slane %v785_v12, %v3685_v31  ;;  %v842_v45 = vrot.slane %v834_v51, %v3685_v31  ;;  %v877_v51 = vrot.slane %v3736_v1, %v3671_v17 }
 0x127   :  { %v4054_v22 = vpop.permute.xlu1 %2305 }
 0x128   :  { %5279 = vst [vmem:[#allocation22_spill] sm:$0xff] %v4054_v22  ;;  %2533 = vrot.lane.b32.xlu0 %v776_v50, %s3623_s16  ;;  %v819_v50 = vcombine.high %v3725_v58, %v3615_v27  ;;  %v818_v58 = vrot.slane %v804_v41, %v3671_v17  ;;  %v803_v59 = vcombine.high %v799_v55, %v3615_v27 }
 0x129   :  { %2537 = vrot.lane.b32.xlu1 %v800_v15, %s3624_s17 }
 0x12a   :  { %v4062_v2 = vpop.permute.xlu0 %2309 }
 0x12b   :  { %5280 = vst [vmem:[#allocation23_spill] sm:$0xff] %v4062_v2  ;;  %v4066_v52 = vpop.permute.xlu1 %2313 }
 0x12c   :  { %5281 = vst [vmem:[#allocation24_spill] sm:$0xff] %v4066_v52  ;;  %2541 = vrot.lane.b32.xlu0 %v783_v26, %s3625_s18  ;;  %v835_v26 = vcombine.high %v811_v9, %v826_v39 }
 0x12d   :  { %2545 = vrot.lane.b32.xlu1 %v801_v25, %s3626_s19  ;;  %v833_v25 = vrot.slane %v819_v50, %v3671_v17  ;;  %v866_v50 = vcombine.high %v842_v45, %v3615_v27 }
 0x12e   :  { %v4074_v33 = vpop.permute.xlu0 %2317  ;;  %v849_v41 = vrot.slane %v835_v26, %v3685_v31 }
 0x12f   :  { %5282 = vst [vmem:[#allocation25_spill] sm:$0xff] %v4074_v33  ;;  %v4078_v15 = vpop.permute.xlu1 %2321  ;;  %v851_v39 = vcombine.high %v818_v58, %v833_v25 }
 0x130   :  { %5283 = vst [vmem:[#allocation26_spill] sm:$0xff] %v4078_v15  ;;  %2549 = vrot.lane.b32.xlu0 %v792_v28, %s3627_s20  ;;  %v867_v5 = vcombine.high %v849_v41, %v3615_v27 }
 0x131   :  { %2553 = vrot.lane.b32.xlu1 %v802_v46, %s3628_s21  ;;  %v850_v46 = vcombine.low %v818_v58, %v833_v25  ;;  %v870_v58 = vcombine.high %v3736_v1, %v3615_v27 }
 0x132   :  { %v4085_v20 = vpop.permute.xlu0 %2325 }
 0x133   :  { %5284 = vst [vmem:[#allocation27_spill] sm:$0xff] %v4085_v20  ;;  %v4088_v24 = vpop.permute.xlu1 %2329 }
 0x134   :  { %5285 = vst [vmem:[#allocation28_spill] sm:$0xff] %v4088_v24  ;;  %2557 = vrot.lane.b32.xlu0 %v799_v55, %s5236_s22  ;;  %v892_v55 = vrot.slane %v3734_v0, %v3671_v17 }
 0x135   :  { %2561 = vrot.lane.b32.xlu1 %v803_v59, %s5228_s23 }
 0x136   :  { %v4094_v28 = vpop.permute.xlu0 %2333  ;;  %v900_v26 = vcombine.low %v877_v51, %v892_v55 }
 0x137   :  { %5286 = vst [vmem:[#allocation29_spill] sm:$0xff] %v4094_v28  ;;  %v4096_v12 = vpop.permute.xlu1 %2337 }
 0x138   :  { %5287 = vst [vmem:[#allocation30_spill] sm:$0xff] %v4096_v12  ;;  %2565 = vrot.lane.b32.xlu0 %v842_v45, %s3631_s24  ;;  %v858_v12 = vrot.slane %v850_v46, %v3685_v31  ;;  %v885_v45 = vcombine.high %v3734_v0, %v3615_v27  ;;  %v884_v0 = vrot.slane %v870_v58, %v3671_v17 }
 0x139   :  { %2569 = vrot.lane.b32.xlu1 %v866_v50, %s3632_s25 }
 0x13a   :  { %v4102_v9 = vpop.permute.xlu0 %2341 }
 0x13b   :  { %5288 = vst [vmem:[#allocation31_spill] sm:$0xff] %v4102_v9  ;;  %v4108_v59 = vpop.permute.xlu1 %2345  ;;  %v865_v9 = vrot.slane %v851_v39, %v3685_v31 }
 0x13c   :  { %5289 = vst [vmem:[#allocation32_spill] sm:$0xff] %v4108_v59  ;;  %2573 = vrot.lane.b32.xlu0 %v849_v41, %s5225_s26  ;;  %v868_v59 = vcombine.high %v858_v12, %v3615_v27  ;;  %v901_v41 = vcombine.high %v877_v51, %v892_v55  ;;  %v958_v55 = vrot.slane %v3744_v6, %v3671_v17 }
 0x13d   :  { %2577 = vrot.lane.b32.xlu1 %v867_v5, %s3634_s27  ;;  %v899_v5 = vrot.slane %v885_v45, %v3671_v17  ;;  %v869_v1 = vcombine.high %v865_v9, %v3615_v27 }
 0x13e   :  { %v4116_v25 = vpop.permute.xlu0 %2349  ;;  %v915_v58 = vrot.slane %v901_v41, %v3685_v31  ;;  %v936_v41 = vcombine.high %v3746_v7, %v3615_v27 }
 0x13f   :  { %5290 = vst [vmem:[#allocation33_spill] sm:$0xff] %v4116_v25  ;;  %v4120_v50 = vpop.permute.xlu1 %2353  ;;  %v916_v39 = vcombine.low %v884_v0, %v899_v5 }
 0x140   :  { %5291 = vst [vmem:[#allocation34_spill] sm:$0xff] %v4120_v50  ;;  %2581 = vrot.lane.b32.xlu0 %v858_v12, %s3635_s28  ;;  %v908_v50 = vrot.slane %v900_v26, %v3685_v31  ;;  %v917_v26 = vcombine.high %v884_v0, %v899_v5 }
 0x141   :  { %2585 = vrot.lane.b32.xlu1 %v868_v59, %s5221_s29  ;;  %s5296_s29 = smov 96  }
 0x142   :  { %v4127_v46 = vpop.permute.xlu0 %2357  ;;  %v932_v45 = vcombine.high %v908_v50, %v3615_v27 }
 0x143   :  { %5292 = vst [vmem:[#allocation35_spill] sm:$0xff] %v4127_v46  ;;  %v4130_v25 = vpop.permute.xlu1 %2361 }
 0x144   :  { %5293 = vst [vmem:[#allocation36_spill] sm:$0xff] %v4130_v25  ;;  %2589 = vrot.lane.b32.xlu0 %v865_v9, %s3637_s30  ;;  %v943_v9 = vrot.slane %v3746_v7, %v3671_v17 }
 0x145   :  { %2593 = vrot.lane.b32.xlu1 %v869_v1, %s3638_s2 }
 0x146   :  { %v4136_v12 = vpop.permute.xlu0 %2365 }
 0x147   :  { %5294 = vst [vmem:[#allocation37_spill] sm:$0xff] %v4136_v12  ;;  %v4138_v59 = vpop.permute.xlu1 %2369  ;;  %v924_v12 = vrot.slane %v916_v39, %v3685_v31 }
 0x148   :  { %5295 = vst [vmem:[#allocation38_spill] sm:$0xff] %v4138_v59  ;;  %2597 = vrot.lane.b32.xlu0 %v908_v50, %s5296_s29  ;;  %v933_v59 = vcombine.high %v915_v58, %v3615_v27  ;;  %v951_v50 = vcombine.high %v3744_v6, %v3615_v27  ;;  %v950_v6 = vrot.slane %v936_v41, %v3671_v17 }
 0x149   :  { %2601 = vrot.lane.b32.xlu1 %v932_v45, %s3640_s4  ;;  %v966_v45 = vcombine.low %v943_v9, %v958_v55  ;;  %v934_v0 = vcombine.high %v924_v12, %v3615_v27 }
 0x14a   :  { %v4148_v51 = vpop.permute.xlu0 %2373  ;;  %v965_v39 = vrot.slane %v951_v50, %v3671_v17 }
 0x14b   :  { %5297 = vst [vmem:[#allocation39_spill] sm:$0xff] %v4148_v51  ;;  %v4150_v1 = vpop.permute.xlu1 %2377  ;;  %v4171_v7 = vrot.slane %v966_v45, %v3685_v31 }
 0x14c   :  { %5298 = vst [vmem:[#allocation40_spill] sm:$0xff] %v4150_v1  ;;  %2605 = vrot.lane.b32.xlu0 %v915_v58, %s5249_s5  ;;  %v931_v1 = vrot.slane %v917_v26, %v3685_v31  ;;  %v983_v41 = vcombine.high %v950_v6, %v965_v39 }
 0x14d   :  { %2609 = vrot.lane.b32.xlu1 %v933_v59, %s5247_s6  ;;  %v967_v59 = vcombine.high %v943_v9, %v958_v55  ;;  %v998_v50 = vcombine.high %v4171_v7, %v3615_v27 }
 0x14e   :  { %v4160_v25 = vpop.permute.xlu0 %2381  ;;  %v935_v46 = vcombine.high %v931_v1, %v3615_v27 }
 0x14f   :  { %v4162_v5 = vpop.permute.xlu1 %2385  ;;  %v981_v55 = vrot.slane %v967_v59, %v3685_v31 }
 0x150   :  { %2613 = vrot.lane.b32.xlu0 %v924_v12, %s5277_s3  ;;  %v982_v12 = vcombine.low %v950_v6, %v965_v39  ;;  %v1017_v39 = vcombine.high %v3756_v18, %v3615_v27  ;;  %v1002_v6 = vcombine.high %v3758_v19, %v3615_v27 }
 0x151   :  { %2617 = vrot.lane.b32.xlu1 %v934_v0, %s3644_s8  ;;  %v999_v0 = vcombine.high %v981_v55, %v3615_v27 }
 0x152   :  { %v4173_v58 = vpop.permute.xlu0 %2389  ;;  %v990_v28 = vrot.slane %v982_v12, %v3685_v31 }
 0x153   :  { %v4175_v51 = vpop.permute.xlu1 %2393 }
 0x154   :  { %2621 = vrot.lane.b32.xlu0 %v931_v1, %s3645_s9  ;;  %v1024_v1 = vrot.slane %v3756_v18, %v3671_v17  ;;  %v1000_v20 = vcombine.high %v990_v28, %v3615_v27  ;;  %v1016_v18 = vrot.slane %v1002_v6, %v3671_v17 }
 0x155   :  { %2625 = vrot.lane.b32.xlu1 %v935_v46, %s3646_s7  ;;  %v1009_v46 = vrot.slane %v3758_v19, %v3671_v17 }
 0x156   :  { %v4180_v26 = vpop.permute.xlu0 %2397 }
 0x157   :  { %v4185_v9 = vpop.permute.xlu1 %2401  ;;  %v1033_v15 = vcombine.high %v1009_v46, %v1024_v1 }
 0x158   :  { %2629 = vrot.lane.b32.xlu0 %v998_v50, %s3619_s12  ;;  %v1032_v50 = vcombine.low %v1009_v46, %v1024_v1  ;;  %v1090_v46 = vrot.slane %v3767_v29, %v3671_v17 }
 0x159   :  { %2633 = vrot.lane.b32.xlu1 %v981_v55, %s3616_s0  ;;  %v997_v55 = vrot.slane %v983_v41, %v3685_v31  ;;  %v1047_v6 = vrot.slane %v1033_v15, %v3685_v31 }
 0x15a   :  { %v4193_v45 = vpop.permute.xlu0 %2405  ;;  %v1040_v52 = vrot.slane %v1032_v50, %v3685_v31 }
 0x15b   :  { %v4197_v59 = vpop.permute.xlu1 %2409  ;;  %v1001_v19 = vcombine.high %v997_v55, %v3615_v27  ;;  %v1065_v16 = vcombine.high %v1047_v6, %v3615_v27 }
 0x15c   :  { %2637 = vrot.lane.b32.xlu0 %v999_v0, %s3617_s10  ;;  %v1031_v0 = vrot.slane %v1017_v39, %v3671_v17  ;;  %v1064_v39 = vcombine.high %v1040_v52, %v3615_v27 }
 0x15d   :  { %2641 = vrot.lane.b32.xlu1 %v990_v28, %s3618_s11 }
 0x15e   :  { %v4205_v24 = vpop.permute.xlu0 %2413  ;;  %v1049_v50 = vcombine.high %v1016_v18, %v1031_v0 }
 0x15f   :  { %v4209_v12 = vpop.permute.xlu1 %2417 }
 0x160   :  { %2645 = vrot.lane.b32.xlu0 %v1000_v20, %s3620_s13  ;;  %v1048_v20 = vcombine.low %v1016_v18, %v1031_v0  ;;  %v1068_v0 = vcombine.high %v3769_v30, %v3615_v27 }
 0x161   :  { %2649 = vrot.lane.b32.xlu1 %v997_v55, %s3621_s14  ;;  %v1075_v55 = vrot.slane %v3769_v30, %v3671_v17 }
 0x162   :  { %v4215_v33 = vpop.permute.xlu0 %2421 }
 0x163   :  { %v4219_v28 = vpop.permute.xlu1 %2425  ;;  %v1098_v18 = vcombine.low %v1075_v55, %v1090_v46 }
 0x164   :  { %2653 = vrot.lane.b32.xlu0 %v1001_v19, %s3622_s15 }
 0x165   :  { %2657 = vrot.lane.b32.xlu1 %v1040_v52, %s3623_s16  ;;  %v1056_v52 = vrot.slane %v1048_v20, %v3685_v31 }
 0x166   :  { %v4223_v41 = vpop.permute.xlu0 %2429 }
 0x167   :  { %5299 = vst [vmem:[#allocation41_spill] sm:$0xff] %v4223_v41  ;;  %v4227_v1 = vpop.permute.xlu1 %2433 }
 0x168   :  { %5300 = vst [vmem:[#allocation42_spill] sm:$0xff] %v4227_v1  ;;  %2661 = vrot.lane.b32.xlu0 %v1064_v39, %s3624_s17  ;;  %v1083_v39 = vcombine.high %v3767_v29, %v3615_v27  ;;  %v1082_v29 = vrot.slane %v1068_v0, %v3671_v17 }
 0x169   :  { %2665 = vrot.lane.b32.xlu1 %v1047_v6, %s3625_s18  ;;  %v1063_v6 = vrot.slane %v1049_v50, %v3685_v31 }
 0x16a   :  { %v4235_v19 = vpop.permute.xlu0 %2437 }
 0x16b   :  { %5301 = vst [vmem:[#allocation43_spill] sm:$0xff] %v4235_v19  ;;  %v4239_v15 = vpop.permute.xlu1 %2441  ;;  %v1066_v19 = vcombine.high %v1056_v52, %v3615_v27  ;;  %v1067_v30 = vcombine.high %v1063_v6, %v3615_v27 }
 0x16c   :  { %5302 = vst [vmem:[#allocation44_spill] sm:$0xff] %v4239_v15  ;;  %2669 = vrot.lane.b32.xlu0 %v1065_v16, %s3626_s19  ;;  %v1097_v16 = vrot.slane %v1083_v39, %v3671_v17  ;;  %v1099_v15 = vcombine.high %v1075_v55, %v1090_v46 }
 0x16d   :  { %2673 = vrot.lane.b32.xlu1 %v1056_v52, %s3627_s20 }
 0x16e   :  { %v4247_v61 = vpop.permute.xlu0 %2445  ;;  %v1114_v50 = vcombine.low %v1082_v29, %v1097_v16  ;;  %v1113_v0 = vrot.slane %v1099_v15, %v3685_v31  ;;  %v1115_v55 = vcombine.high %v1082_v29, %v1097_v16  ;;  %v1149_v16 = vcombine.high %v3776_v37, %v3615_v27 }
 0x16f   :  { %5303 = vst [vmem:[#allocation45_spill] sm:$0xff] %v4247_v61  ;;  %v4251_v20 = vpop.permute.xlu1 %2449  ;;  %v1106_v61 = vrot.slane %v1098_v18, %v3685_v31  ;;  %v1156_v18 = vrot.slane %v3776_v37, %v3671_v17  ;;  %v1134_v29 = vcombine.high %v3778_v40, %v3615_v27 }
 0x170   :  { %5304 = vst [vmem:[#allocation46_spill] sm:$0xff] %v4251_v20  ;;  %2677 = vrot.lane.b32.xlu0 %v1066_v19, %s3628_s21 }
 0x171   :  { %2681 = vrot.lane.b32.xlu1 %v1063_v6, %s5236_s22  ;;  %v1130_v39 = vcombine.high %v1106_v61, %v3615_v27  ;;  %v1141_v6 = vrot.slane %v3778_v40, %v3671_v17  ;;  %v1148_v37 = vrot.slane %v1134_v29, %v3671_v17 }
 0x172   :  { %v4257_v1 = vpop.permute.xlu0 %2453 }
 0x173   :  { %5305 = vst [vmem:[#allocation47_spill] sm:$0xff] %v4257_v1  ;;  %v4261_v52 = vpop.permute.xlu1 %2457 }
 0x174   :  { %5306 = vst [vmem:[#allocation48_spill] sm:$0xff] %v4261_v52  ;;  %2685 = vrot.lane.b32.xlu0 %v1067_v30, %s5228_s23 }
 0x175   :  { %2689 = vrot.lane.b32.xlu1 %v1106_v61, %s3631_s24  ;;  %v1122_v61 = vrot.slane %v1114_v50, %v3685_v31 }
 0x176   :  { %v4265_v19 = vpop.permute.xlu0 %2461 }
 0x177   :  { %5307 = vst [vmem:[#allocation49_spill] sm:$0xff] %v4265_v19  ;;  %v4269_v46 = vpop.permute.xlu1 %2465  ;;  %v1131_v19 = vcombine.high %v1113_v0, %v3615_v27 }
 0x178   :  { %5308 = vst [vmem:[#allocation50_spill] sm:$0xff] %v4269_v46  ;;  %2693 = vrot.lane.b32.xlu0 %v1130_v39, %s3632_s25  ;;  %v1164_v39 = vcombine.low %v1141_v6, %v1156_v18 }
 0x179   :  { %2697 = vrot.lane.b32.xlu1 %v1113_v0, %s5225_s26  ;;  %v1129_v0 = vrot.slane %v1115_v55, %v3685_v31  ;;  %s5313_s26 = smov 84  }
 0x17a   :  { %v4277_v30 = vpop.permute.xlu0 %2469 }
 0x17b   :  { %5309 = vst [vmem:[#allocation51_spill] sm:$0xff] %v4277_v30  ;;  %v4281_v15 = vpop.permute.xlu1 %2473  ;;  %v1132_v30 = vcombine.high %v1122_v61, %v3615_v27  ;;  %v1133_v40 = vcombine.high %v1129_v0, %v3615_v27 }
 0x17c   :  { %5310 = vst [vmem:[#allocation52_spill] sm:$0xff] %v4281_v15  ;;  %2701 = vrot.lane.b32.xlu0 %v1131_v19, %s3634_s27  ;;  %v1163_v19 = vrot.slane %v1149_v16, %v3671_v17  ;;  %v1165_v15 = vcombine.high %v1141_v6, %v1156_v18  ;;  %v1222_v18 = vrot.slane %v3786_v48, %v3671_v17 }
 0x17d   :  { %2705 = vrot.lane.b32.xlu1 %v1122_v61, %s3635_s28  ;;  %v1207_v6 = vrot.slane %v3788_v49, %v3671_v17 }
 0x17e   :  { %v4289_v46 = vpop.permute.xlu0 %2477  ;;  %v1180_v55 = vcombine.low %v1148_v37, %v1163_v19  ;;  %v1179_v29 = vrot.slane %v1165_v15, %v3685_v31  ;;  %v1215_v15 = vcombine.high %v3786_v48, %v3615_v27 }
 0x17f   :  { %5311 = vst [vmem:[#allocation53_spill] sm:$0xff] %v4289_v46  ;;  %v4293_v50 = vpop.permute.xlu1 %2481  ;;  %v1172_v46 = vrot.slane %v1164_v39, %v3685_v31 }
 0x180   :  { %5312 = vst [vmem:[#allocation54_spill] sm:$0xff] %v4293_v50  ;;  %2709 = vrot.lane.b32.xlu0 %v1132_v30, %s5313_s26 }
 0x181   :  { %2713 = vrot.lane.b32.xlu1 %v1129_v0, %s3637_s30  ;;  %v1196_v16 = vcombine.high %v1172_v46, %v3615_v27  ;;  %v1181_v0 = vcombine.high %v1148_v37, %v1163_v19 }
 0x182   :  { %v4299_v52 = vpop.permute.xlu0 %2485 }
 0x183   :  { %5314 = vst [vmem:[#allocation55_spill] sm:$0xff] %v4299_v52  ;;  %v4303_v61 = vpop.permute.xlu1 %2489  ;;  %v1230_v52 = vcombine.low %v1207_v6, %v1222_v18 }
 0x184   :  { %5315 = vst [vmem:[#allocation56_spill] sm:$0xff] %v4303_v61  ;;  %2717 = vrot.lane.b32.xlu0 %v1133_v40, %s3638_s2  ;;  %v1200_v61 = vcombine.high %v3788_v49, %v3615_v27 }
 0x185   :  { %2721 = vrot.lane.b32.xlu1 %v1172_v46, %s5296_s29  ;;  %v1188_v46 = vrot.slane %v1180_v55, %v3685_v31  ;;  %v1229_v55 = vrot.slane %v1215_v15, %v3671_v17  ;;  %v4338_v49 = vrot.slane %v1230_v52, %v3685_v31  ;;  %v1288_v15 = vrot.slane %v3798_v57, %v3671_v17 }
 0x186   :  { %v4307_v30 = vpop.permute.xlu0 %2493  ;;  %v1214_v48 = vrot.slane %v1200_v61, %v3671_v17 }
 0x187   :  { %5316 = vst [vmem:[#allocation57_spill] sm:$0xff] %v4307_v30  ;;  %v4315_v39 = vpop.permute.xlu1 %2497  ;;  %v1197_v30 = vcombine.high %v1179_v29, %v3615_v27  ;;  %v1198_v37 = vcombine.high %v1188_v46, %v3615_v27  ;;  %5319 = vst [vmem:[#allocation60_spill] sm:$0xff] %v4338_v49  ;;  %v1262_v61 = vcombine.high %v4338_v49, %v3615_v27 }
 0x188   :  { %5317 = vst [vmem:[#allocation58_spill] sm:$0xff] %v4315_v39  ;;  %2725 = vrot.lane.b32.xlu0 %v1196_v16, %s3640_s4  ;;  %v1195_v16 = vrot.slane %v1181_v0, %v3685_v31  ;;  %v1246_v39 = vcombine.low %v1214_v48, %v1229_v55  ;;  %v1247_v52 = vcombine.high %v1214_v48, %v1229_v55 }
 0x189   :  { %2729 = vrot.lane.b32.xlu1 %v1179_v29, %s5249_s5  ;;  %v1231_v29 = vcombine.high %v1207_v6, %v1222_v18  ;;  %v1281_v55 = vcombine.high %v3798_v57, %v3615_v27 }
 0x18a   :  { %v4319_v40 = vpop.permute.xlu0 %2501  ;;  %v1254_v49 = vrot.slane %v1246_v39, %v3685_v31  ;;  %v1261_v2 = vrot.slane %v1247_v52, %v3685_v31 }
 0x18b   :  { %5318 = vst [vmem:[#allocation59_spill] sm:$0xff] %v4319_v40  ;;  %v4327_v50 = vpop.permute.xlu1 %2505  ;;  %v1245_v18 = vrot.slane %v1231_v29, %v3685_v31  ;;  %v1266_v29 = vcombine.high %v3800_v60, %v3615_v27 }
 0x18c   :  { %2733 = vrot.lane.b32.xlu0 %v1197_v30, %s5247_s6  ;;  %v1264_v20 = vcombine.high %v1254_v49, %v3615_v27 }
 0x18d   :  { %2737 = vrot.lane.b32.xlu1 %v1188_v46, %s5277_s3  ;;  %v1199_v46 = vcombine.high %v1195_v16, %v3615_v27  ;;  %v1263_v1 = vcombine.high %v1245_v18, %v3615_v27  ;;  %v1280_v57 = vrot.slane %v1266_v29, %v3671_v17 }
 0x18e   :  { %v4331_v19 = vpop.permute.xlu0 %2509 }
 0x18f   :  { %v4340_v40 = vpop.permute.xlu1 %2513 }
 0x190   :  { %2741 = vrot.lane.b32.xlu0 %v1198_v37, %s3644_s8  ;;  %v1273_v37 = vrot.slane %v3800_v60, %v3671_v17  ;;  %v1265_v60 = vcombine.high %v1261_v2, %v3615_v27 }
 0x191   :  { %2745 = vrot.lane.b32.xlu1 %v1195_v16, %s3645_s9 }
 0x192   :  { %v4344_v30 = vpop.permute.xlu0 %2517 }
 0x193   :  { %v4347_v0 = vpop.permute.xlu1 %2521 }
 0x194   :  { %2749 = vrot.lane.b32.xlu0 %v1199_v46, %s3646_s7  ;;  %v1296_v46 = vcombine.low %v1273_v37, %v1288_v15 }
 0x195   :  { %2753 = vrot.lane.b32.xlu1 %v1262_v61, %s3619_s12 }
 0x196   :  { %v4354_v6 = vpop.permute.xlu0 %2525  ;;  %v1304_v41 = vrot.slane %v1296_v46, %v3685_v31  ;;  %v1339_v46 = vrot.slane %v3811_v4, %v3671_v17 }
 0x197   :  { %v4360_v16 = vpop.permute.xlu1 %2529 }
 0x198   :  { %2757 = vrot.lane.b32.xlu0 %v1245_v18, %s3616_s0  ;;  %v1297_v18 = vcombine.high %v1273_v37, %v1288_v15  ;;  %v1354_v15 = vrot.slane %v3809_v3, %v3671_v17 }
 0x199   :  { %2761 = vrot.lane.b32.xlu1 %v1263_v1, %s3617_s10  ;;  %v1295_v1 = vrot.slane %v1281_v55, %v3671_v17  ;;  %v1328_v55 = vcombine.high %v1304_v41, %v3615_v27 }
 0x19a   :  { %v4368_v48 = vpop.permute.xlu0 %2533  ;;  %v1311_v29 = vrot.slane %v1297_v18, %v3685_v31 }
 0x19b   :  { %v4372_v61 = vpop.permute.xlu1 %2537 }
 0x19c   :  { %2765 = vrot.lane.b32.xlu0 %v1254_v49, %s3618_s11 }
 0x19d   :  { %2769 = vrot.lane.b32.xlu1 %v1264_v20, %s3620_s13  ;;  %v1312_v20 = vcombine.low %v1280_v57, %v1295_v1 }
 0x19e   :  { %v4379_v39 = vpop.permute.xlu0 %2541 }
 0x19f   :  { %v4382_v22 = vpop.permute.xlu1 %2545 }
 0x1a0   :  { %2773 = vrot.lane.b32.xlu0 %v1261_v2, %s3621_s14  ;;  %v1313_v2 = vcombine.high %v1280_v57, %v1295_v1  ;;  %v1332_v1 = vcombine.high %v3811_v4, %v3615_v27  ;;  %v1362_v57 = vcombine.low %v1339_v46, %v1354_v15 }
 0x1a1   :  { %2777 = vrot.lane.b32.xlu1 %v1265_v60, %s3622_s15 }
 0x1a2   :  { %v4388_v49 = vpop.permute.xlu0 %2549 }
 0x1a3   :  { %5320 = vst [vmem:[#allocation61_spill] sm:$0xff] %v4388_v49  ;;  %v4390_v52 = vpop.permute.xlu1 %2553  ;;  %v1320_v49 = vrot.slane %v1312_v20, %v3685_v31 }
 0x1a4   :  { %5321 = vst [vmem:[#allocation62_spill] sm:$0xff] %v4390_v52  ;;  %2781 = vrot.lane.b32.xlu0 %v1304_v41, %s3623_s16  ;;  %v1329_v52 = vcombine.high %v1311_v29, %v3615_v27  ;;  %v1347_v41 = vcombine.high %v3809_v3, %v3615_v27  ;;  %v1346_v3 = vrot.slane %v1332_v1, %v3671_v17 }
 0x1a5   :  { %2785 = vrot.lane.b32.xlu1 %v1328_v55, %s3624_s17 }
 0x1a6   :  { %v4398_v37 = vpop.permute.xlu0 %2557  ;;  %v1361_v20 = vrot.slane %v1347_v41, %v3671_v17 }
 0x1a7   :  { %5322 = vst [vmem:[#allocation63_spill] sm:$0xff] %v4398_v37  ;;  %v4402_v60 = vpop.permute.xlu1 %2561  ;;  %v1327_v37 = vrot.slane %v1313_v2, %v3685_v31 }
 0x1a8   :  { %5323 = vst [vmem:[#allocation64_spill] sm:$0xff] %v4402_v60  ;;  %2789 = vrot.lane.b32.xlu0 %v1311_v29, %s3625_s18  ;;  %v1330_v60 = vcombine.high %v1320_v49, %v3615_v27  ;;  %v1363_v29 = vcombine.high %v1339_v46, %v1354_v15  ;;  %v1378_v2 = vcombine.low %v1346_v3, %v1361_v20 }
 0x1a9   :  { %2793 = vrot.lane.b32.xlu1 %v1329_v52, %s3626_s19  ;;  %v1331_v4 = vcombine.high %v1327_v37, %v3615_v27  ;;  %v1379_v15 = vcombine.high %v1346_v3, %v1361_v20  ;;  %v1398_v3 = vcombine.high %v3820_v13, %v3615_v27 }
 0x1aa   :  { %v4410_v18 = vpop.permute.xlu0 %2565  ;;  %v1377_v1 = vrot.slane %v1363_v29, %v3685_v31 }
 0x1ab   :  { %5324 = vst [vmem:[#allocation65_spill] sm:$0xff] %v4410_v18  ;;  %v4414_v55 = vpop.permute.xlu1 %2569 }
 0x1ac   :  { %5325 = vst [vmem:[#allocation66_spill] sm:$0xff] %v4414_v55  ;;  %2797 = vrot.lane.b32.xlu0 %v1320_v49, %s3627_s20  ;;  %v1370_v55 = vrot.slane %v1362_v57, %v3685_v31  ;;  %v1405_v57 = vrot.slane %v3820_v13, %v3671_v17 }
 0x1ad   :  { %2801 = vrot.lane.b32.xlu1 %v1330_v60, %s3628_s21 }
 0x1ae   :  { %v4421_v52 = vpop.permute.xlu0 %2573  ;;  %v1394_v41 = vcombine.high %v1370_v55, %v3615_v27 }
 0x1af   :  { %v4424_v18 = vpop.permute.xlu1 %2577 }
 0x1b0   :  { %2805 = vrot.lane.b32.xlu0 %v1327_v37, %s5236_s22  ;;  %v1420_v37 = vrot.slane %v3818_v10, %v3671_v17 }
 0x1b1   :  { %2809 = vrot.lane.b32.xlu1 %v1331_v4, %s5228_s23  ;;  %s5330_s23 = smov 72  }
 0x1b2   :  { %v4430_v49 = vpop.permute.xlu0 %2581  ;;  %v1428_v29 = vcombine.low %v1405_v57, %v1420_v37 }
 0x1b3   :  { %5326 = vst [vmem:[#allocation67_spill] sm:$0xff] %v4430_v49  ;;  %v4432_v60 = vpop.permute.xlu1 %2585  ;;  %v1386_v49 = vrot.slane %v1378_v2, %v3685_v31 }
 0x1b4   :  { %5327 = vst [vmem:[#allocation68_spill] sm:$0xff] %v4432_v60  ;;  %2813 = vrot.lane.b32.xlu0 %v1370_v55, %s3631_s24  ;;  %v1395_v60 = vcombine.high %v1377_v1, %v3615_v27  ;;  %v1413_v55 = vcombine.high %v3818_v10, %v3615_v27 }
 0x1b5   :  { %2817 = vrot.lane.b32.xlu1 %v1394_v41, %s3632_s25 }
 0x1b6   :  { %v4438_v46 = vpop.permute.xlu0 %2589  ;;  %v1427_v2 = vrot.slane %v1413_v55, %v3671_v17 }
 0x1b7   :  { %5328 = vst [vmem:[#allocation69_spill] sm:$0xff] %v4438_v46  ;;  %v4444_v4 = vpop.permute.xlu1 %2593  ;;  %v1393_v46 = vrot.slane %v1379_v15, %v3685_v31 }
 0x1b8   :  { %5329 = vst [vmem:[#allocation70_spill] sm:$0xff] %v4444_v4  ;;  %2821 = vrot.lane.b32.xlu0 %v1377_v1, %s5330_s23  ;;  %v1396_v4 = vcombine.high %v1386_v49, %v3615_v27  ;;  %v1429_v1 = vcombine.high %v1405_v57, %v1420_v37 }
 0x1b9   :  { %2825 = vrot.lane.b32.xlu1 %v1395_v60, %s3634_s27  ;;  %v1412_v60 = vrot.slane %v1398_v3, %v3671_v17 }
 0x1ba   :  { %v4452_v20 = vpop.permute.xlu0 %2597  ;;  %v1443_v57 = vrot.slane %v1429_v1, %v3685_v31  ;;  %v1479_v1 = vcombine.high %v3830_v11, %v3615_v27 }
 0x1bb   :  { %5331 = vst [vmem:[#allocation71_spill] sm:$0xff] %v4452_v20  ;;  %v4456_v41 = vpop.permute.xlu1 %2601  ;;  %v1436_v20 = vrot.slane %v1428_v29, %v3685_v31 }
 0x1bc   :  { %5332 = vst [vmem:[#allocation72_spill] sm:$0xff] %v4456_v41  ;;  %2829 = vrot.lane.b32.xlu0 %v1386_v49, %s3635_s28  ;;  %v1397_v41 = vcombine.high %v1393_v46, %v3615_v27  ;;  %v3249_v49 = vsel %vm3248_vm0, %v3702_v42, %v4008_v62  ;;  %v1445_v42 = vcombine.high %v1412_v60, %v1427_v2 }
 0x1bd   :  { %2833 = vrot.lane.b32.xlu1 %v1396_v4, %s5313_s26  ;;  %v1444_v4 = vcombine.low %v1412_v60, %v1427_v2  ;;  %v1460_v37 = vcombine.high %v1436_v20, %v3615_v27  ;;  %v3251_v3 = vsel %vm3250_vm1, %v3249_v49, %v3979_v34  ;;  %v1486_v62 = vrot.slane %v3830_v11, %v3671_v17 }
 0x1be   :  { %v4463_v10 = vpop.permute.xlu0 %2605  ;;  %v3310_v34 = vsel %vm3248_vm0, %v3851_v21, %v4160_v25  ;;  %v1461_v2 = vcombine.high %v1443_v57, %v3615_v27  ;;  %v1464_v49 = vcombine.high %v3835_v36, %v3615_v27  ;;  %v3341_v11 = vsel %vm3248_vm0, %v4002_v44, %v4327_v50 }
 0x1bf   :  { %v4466_v13 = vpop.permute.xlu1 %2609  ;;  %v1452_v60 = vrot.slane %v1444_v4, %v3685_v31  ;;  %v3311_v25 = vsel %vm3250_vm1, %v3310_v34, %v4162_v5  ;;  %v1459_v4 = vrot.slane %v1445_v42, %v3685_v31  ;;  %v1493_v5 = vrot.slane %v1479_v1, %v3671_v17 }
 0x1c0   :  { %2837 = vrot.lane.b32.xlu0 %v1393_v46, %s3637_s30  ;;  %v1471_v46 = vrot.slane %v3835_v36, %v3671_v17  ;;  %v1478_v42 = vrot.slane %v1464_v49, %v3671_v17 }
 0x1c1   :  { %2841 = vrot.lane.b32.xlu1 %v1397_v41, %s3638_s2  ;;  %v3253_v41 = vsel %vm3252_vm2, %v3251_v3, %v3991_v8 }
 0x1c2   :  { %v4475_v15 = vpop.permute.xlu0 %2613  ;;  %v1494_v8 = vcombine.low %v1471_v46, %v1486_v62  ;;  %v3255_v21 = vsel %vm3254_vm3, %v3253_v41, %v4004_v32  ;;  %v3342_v32 = vsel %vm3250_vm1, %v3341_v11, %v4331_v19  ;;  %v1495_v44 = vcombine.high %v1471_v46, %v1486_v62 }
 0x1c3   :  { %v4477_v55 = vpop.permute.xlu1 %2617  ;;  %v1463_v62 = vcombine.high %v1459_v4, %v3615_v27  ;;  %v1510_v49 = vcombine.low %v1478_v42, %v1493_v5  ;;  %v1511_v11 = vcombine.high %v1478_v42, %v1493_v5 }
 0x1c4   :  { %2845 = vrot.lane.b32.xlu0 %v1436_v20, %s5296_s29 }
 0x1c5   :  { %2849 = vrot.lane.b32.xlu1 %v1460_v37, %s3640_s4 }
 0x1c6   :  { %v4489_v29 = vpop.permute.xlu0 %2621 }
 0x1c7   :  { %v4496_v20 = vpop.permute.xlu1 %2625 }
 0x1c8   :  { %2853 = vrot.lane.b32.xlu0 %v1443_v57, %s5249_s5  ;;  %v3312_v57 = vsel %vm3252_vm2, %v3311_v25, %v4173_v58  ;;  %v3257_v58 = vsel %vm3256_vm4, %v3255_v21, %v4011_v54 }
 0x1c9   :  { %2857 = vrot.lane.b32.xlu1 %v1461_v2, %s5247_s6  ;;  %v1462_v2 = vcombine.high %v1452_v60, %v3615_v27  ;;  %v3313_v50 = vsel %vm3254_vm3, %v3312_v57, %v4175_v51  ;;  %v3259_v46 = vsel %vm3258_vm5, %v3257_v58, %v4018_v14  ;;  %v1509_v14 = vrot.slane %v1495_v44, %v3685_v31 }
 0x1ca   :  { %v2630_v37 = vpop.permute.xlu0 %2629  ;;  %v3314_v34 = vsel %vm3256_vm4, %v3313_v50, %v4180_v26  ;;  %v1530_v50 = vcombine.high %v3853_v56, %v3615_v27 }
 0x1cb   :  { %v3372_v36 = vsel %vm3248_vm0, %v4171_v7, %v2630_v37  ;;  %v2634_v3 = vpop.permute.xlu1 %2633  ;;  %v4528_v7 = vrot.slane %v1494_v8, %v3685_v31  ;;  %v3315_v26 = vsel %vm3258_vm5, %v3314_v34, %v4185_v9 }
 0x1cc   :  { %2861 = vrot.lane.b32.xlu0 %v1452_v60, %s5277_s3  ;;  %v3373_v19 = vsel %vm3250_vm1, %v3372_v36, %v2634_v3  ;;  %v3343_v60 = vsel %vm3252_vm2, %v3342_v32, %v4340_v40  ;;  %v3316_v25 = vsel %vm5252_vm6, %v3315_v26, %v4193_v45  ;;  %v1552_v36 = vrot.slane %v3842_v47, %v3671_v17 }
 0x1cd   :  { %2865 = vrot.lane.b32.xlu1 %v1462_v2, %s3644_s8  ;;  %v3344_v51 = vsel %vm3254_vm3, %v3343_v60, %v4344_v30  ;;  %v1526_v21 = vcombine.high %v4528_v7, %v3615_v27  ;;  %v3261_v30 = vsel %vm5252_vm6, %v3259_v46, %v4024_v38  ;;  %v1537_v38 = vrot.slane %v3853_v56, %v3671_v17 }
 0x1ce   :  { %v2638_v41 = vpop.permute.xlu0 %2637  ;;  %v3345_v37 = vsel %vm3256_vm4, %v3344_v51, %v4347_v0  ;;  %v1518_v45 = vrot.slane %v1510_v49, %v3685_v31  ;;  %v3263_v0 = vsel %vm5251_vm7, %v3261_v30, %v4032_v43  ;;  %v3317_v3 = vsel %vm5251_vm7, %v3316_v25, %v4197_v59  ;;  %v5334_v25 = vld [vmem:[#allocation61_spill] sm:$0xff] }
 0x1cf   :  { %v3374_v54 = vsel %vm3252_vm2, %v3373_v19, %v2638_v41  ;;  %v2642_v1 = vpop.permute.xlu1 %2641  ;;  %v3346_v57 = vsel %vm3258_vm5, %v3345_v37, %v4354_v6  ;;  %v1527_v32 = vcombine.high %v1509_v14, %v3615_v27  ;;  %v3318_v5 = vsel %vm5254_vm8, %v3317_v3, %v4205_v24  ;;  %v5335_v37 = vld [vmem:[#allocation22_spill] sm:$0xff]  ;;  %v5338_v3 = vld [vmem:[#allocation43_spill] sm:$0xff] }
 0x1d0   :  { %2869 = vrot.lane.b32.xlu0 %v1459_v4, %s3645_s9  ;;  %v3375_v40 = vsel %vm3254_vm3, %v3374_v54, %v2642_v1  ;;  %v3347_v42 = vsel %vm5252_vm6, %v3346_v57, %v4360_v16  ;;  %v1545_v43 = vcombine.high %v3842_v47, %v3615_v27  ;;  %v1560_v19 = vcombine.low %v1537_v38, %v1552_v36  ;;  %v5336_v57 = vld [vmem:[#allocation23_spill] sm:$0xff] }
 0x1d1   :  { %2873 = vrot.lane.b32.xlu1 %v1463_v62, %s3646_s7  ;;  %v3348_v59 = vsel %vm5251_vm7, %v3347_v42, %v4368_v48  ;;  %v3265_v24 = vsel %vm5254_vm8, %v3263_v0, %v4036_v23  ;;  %v1525_v16 = vrot.slane %v1511_v11, %v3685_v31  ;;  %v3319_v41 = vsel %vm5253_vm9, %v3318_v5, %v4209_v12  ;;  %v5337_v11 = vld [vmem:[#allocation42_spill] sm:$0xff] }
 0x1d2   :  { %v2646_v8 = vpop.permute.xlu0 %2645  ;;  %v3267_v47 = vsel %vm5253_vm9, %v3265_v24, %v4043_v35  ;;  %v1528_v60 = vcombine.high %v1518_v45, %v3615_v27  ;;  %v3320_v56 = vsel %vm5230_vm10, %v3319_v41, %v4215_v33  ;;  %v3349_v23 = vsel %vm5254_vm8, %v3348_v59, %v4372_v61 }
 0x1d3   :  { %v3376_v4 = vsel %vm3256_vm4, %v3375_v40, %v2646_v8  ;;  %v2650_v9 = vpop.permute.xlu1 %2649  ;;  %v4601_v35 = vrot.slane %v1545_v43, %v3671_v17  ;;  %v3350_v12 = vsel %vm5253_vm9, %v3349_v23, %v4379_v39  ;;  %v1544_v62 = vrot.slane %v1530_v50, %v3671_v17  ;;  %v5333_v8 = vld [vmem:[#allocation41_spill] sm:$0xff]  ;;  %v5341_v43 = vld [vmem:[#allocation63_spill] sm:$0xff] }
 0x1d4   :  { %2877 = vrot.lane.b32.xlu0 %v1526_v21, %s3619_s12  ;;  %v3377_v6 = vsel %vm3258_vm5, %v3376_v4, %v2650_v9  ;;  %v1561_v46 = vcombine.high %v1537_v38, %v1552_v36  ;;  %v3269_v33 = vsel %vm5230_vm10, %v3267_v47, %v4046_v63  ;;  %v1568_v61 = vrot.slane %v1560_v19, %v3685_v31  ;;  %v5342_v19 = vld [vmem:[#allocation4_spill] sm:$0xff] }
 0x1d5   :  { %2881 = vrot.lane.b32.xlu1 %v1509_v14, %s3616_s0  ;;  %v3271_v51 = vsel %vm5232_vm11, %v3269_v33, %v4052_v53  ;;  %v3321_v49 = vsel %vm5232_vm11, %v3320_v56, %v4219_v28  ;;  %v1529_v40 = vcombine.high %v1525_v16, %v3615_v27  ;;  %v3351_v63 = vsel %vm5230_vm10, %v3350_v12, %v4382_v22 }
 0x1d6   :  { %v2654_v2 = vpop.permute.xlu0 %2653  ;;  %v3322_v21 = vsel %vm5231_vm12, %v3321_v49, %v5333_v8  ;;  %v3352_v53 = vsel %vm5232_vm11, %v3351_v63, %v5334_v25  ;;  %v1576_v28 = vcombine.low %v1544_v62, %v4601_v35  ;;  %v3273_v4 = vsel %vm5231_vm12, %v3271_v51, %v5335_v37  ;;  %v5348_v49 = vld [vmem:[#allocation65_spill] sm:$0xff]  ;;  %v5349_v8 = vld [vmem:[#allocation26_spill] sm:$0xff] }
 0x1d7   :  { %v3378_v58 = vsel %vm5252_vm6, %v3377_v6, %v2654_v2  ;;  %v2658_v44 = vpop.permute.xlu1 %2657  ;;  %v1575_v9 = vrot.slane %v1561_v46, %v3685_v31  ;;  %v3275_v22 = vsel %vm5234_vm13, %v3273_v4, %v5336_v57  ;;  %v3323_v36 = vsel %vm5234_vm13, %v3322_v21, %v5337_v11  ;;  %v5339_v2 = vld [vmem:[#allocation62_spill] sm:$0xff] }
 0x1d8   :  { %2885 = vrot.lane.b32.xlu0 %v1527_v32, %s3617_s10  ;;  %v3379_v48 = vsel %vm5251_vm7, %v3378_v58, %v2658_v44  ;;  %v1592_v0 = vcombine.high %v1568_v61, %v3615_v27  ;;  %v3324_v6 = vsel %vm5233_vm14, %v3323_v36, %v5338_v3  ;;  %v3353_v32 = vsel %vm5231_vm12, %v3352_v53, %v5339_v2  ;;  %v5340_v58 = vld [vmem:[#allocation2_spill] sm:$0xff]  ;;  %v5354_v2 = vld [vmem:[#allocation28_spill] sm:$0xff] }
 0x1d9   :  { %2889 = vrot.lane.b32.xlu1 %v1518_v45, %s3618_s11  ;;  %v4643_v44 = vrot.slane %v5340_v58, %v3671_v17  ;;  %v3354_v59 = vsel %vm5234_vm13, %v3353_v32, %v5341_v43  ;;  %v1577_v50 = vcombine.high %v1544_v62, %v4601_v35  ;;  %v4651_v24 = vrot.slane %v5342_v19, %v3671_v17  ;;  %v5346_v35 = vld [vmem:[#allocation45_spill] sm:$0xff]  ;;  %v5347_v62 = vld [vmem:[#allocation64_spill] sm:$0xff]  ;;  %v5351_v25 = vld [vmem:[#allocation46_spill] sm:$0xff] }
 0x1da   :  { %v2662_v34 = vpop.permute.xlu0 %2661  ;;  %v1584_v41 = vrot.slane %v1576_v28, %v3685_v31  ;;  %v3355_v46 = vsel %vm5233_vm14, %v3354_v59, %v5347_v62  ;;  %v1611_v51 = vcombine.high %v5340_v58, %v3615_v27  ;;  %v5356_v43 = vld [vmem:[#allocation48_spill] sm:$0xff] }
 0x1db   :  { %v3380_v54 = vsel %vm5254_vm8, %v3379_v48, %v2662_v34  ;;  %v2666_v1 = vpop.permute.xlu1 %2665  ;;  %v5344_v48 = vld [vmem:[#allocation25_spill] sm:$0xff]  ;;  %v1591_v63 = vrot.slane %v1577_v50, %v3685_v31 }
 0x1dc   :  { %2893 = vrot.lane.b32.xlu0 %v1528_v60, %s3620_s13  ;;  %v3381_v39 = vsel %vm5253_vm9, %v3380_v54, %v2666_v1  ;;  %v5345_v60 = vld [vmem:[#allocation44_spill] sm:$0xff]  ;;  %v1593_v1 = vcombine.high %v1575_v9, %v3615_v27  ;;  %v1594_v4 = vcombine.high %v1584_v41, %v3615_v27 }
 0x1dd   :  { %2897 = vrot.lane.b32.xlu1 %v1525_v16, %s3621_s14  ;;  %v5343_v16 = vld [vmem:[#allocation24_spill] sm:$0xff]  ;;  %v3325_v56 = vsel %vm5240_vm15, %v3324_v6, %v5345_v60  ;;  %v1627_v6 = vcombine.high %v4651_v24, %v4643_v44 }
 0x1de   :  { %v2670_v26 = vpop.permute.xlu0 %2669  ;;  %v3277_v47 = vsel %vm5233_vm14, %v3275_v22, %v5343_v16  ;;  %v5353_v22 = vld [vmem:[#allocation66_spill] sm:$0xff] }
 0x1df   :  { %v3382_v14 = vsel %vm5230_vm10, %v3381_v39, %v2670_v26  ;;  %v2674_v30 = vpop.permute.xlu1 %2673  ;;  %vm5235_vm10 = vcmask 556032   ;;  %v3279_v34 = vsel %vm5240_vm15, %v3277_v47, %v5344_v48  ;;  %v3356_v39 = vsel %vm5240_vm15, %v3355_v46, %v5348_v49  ;;  %v5358_v48 = vld [vmem:[#allocation67_spill] sm:$0xff]  ;;  %v5364_v49 = vld [vmem:[#allocation68_spill] sm:$0xff] }
 0x1e0   :  { %2901 = vrot.lane.b32.xlu0 %v1529_v40, %s3622_s15  ;;  %v3383_v38 = vsel %vm5232_vm11, %v3382_v14, %v2674_v30  ;;  %v3326_v12 = vsel %vm5235_vm10, %v3325_v56, %v5346_v35  ;;  %vm5239_vm11 = vcmask 621568   ;;  %v1596_v26 = vcombine.high %v5342_v19, %v3615_v27  ;;  %v5350_v14 = vld [vmem:[#allocation27_spill] sm:$0xff]  ;;  %v5360_v56 = vld [vmem:[#allocation30_spill] sm:$0xff] }
 0x1e1   :  { %2905 = vrot.lane.b32.xlu1 %v1568_v61, %s3623_s16  ;;  %v1626_v40 = vcombine.low %v4651_v24, %v4643_v44  ;;  %v3281_v21 = vsel %vm5235_vm10, %v3279_v34, %v5349_v8  ;;  %v3357_v11 = vsel %vm5235_vm10, %v3356_v39, %v5353_v22  ;;  %v1595_v19 = vcombine.high %v1591_v63, %v3615_v27  ;;  %v5357_v44 = vld [vmem:[#allocation49_spill] sm:$0xff]  ;;  %v5362_v35 = vld [vmem:[#allocation50_spill] sm:$0xff]  ;;  %v5370_v22 = vld [vmem:[#allocation52_spill] sm:$0xff] }
 0x1e2   :  { %v2678_v45 = vpop.permute.xlu0 %2677  ;;  %v1610_v3 = vrot.slane %v1596_v26, %v3671_v17 }
 0x1e3   :  { %v3384_v5 = vsel %vm5231_vm12, %v3383_v38, %v2678_v45  ;;  %v2682_v42 = vpop.permute.xlu1 %2681  ;;  %vm5238_vm12 = vcmask 588800   ;;  %v4693_v45 = vrot.slane %v1611_v51, %v3671_v17 }
 0x1e4   :  { %2909 = vrot.lane.b32.xlu0 %v1592_v0, %s3624_s17  ;;  %v3385_v23 = vsel %vm5234_vm13, %v3384_v5, %v2682_v42  ;;  %v3283_v30 = vsel %vm5238_vm12, %v3281_v21, %v5350_v14  ;;  %v3327_v53 = vsel %vm5238_vm12, %v3326_v12, %v5351_v25  ;;  %vm5241_vm13 = vcmask 687104   ;;  %v5355_v42 = vld [vmem:[#allocation29_spill] sm:$0xff]  ;;  %v5366_v14 = vld [vmem:[#allocation3_spill] sm:$0xff]  ;;  %v5367_v25 = vld [vmem:[#allocation6_spill] sm:$0xff] }
 0x1e5   :  { %2913 = vrot.lane.b32.xlu1 %v1575_v9, %s3625_s18  ;;  %v5352_v9 = vld [vmem:[#allocation47_spill] sm:$0xff]  ;;  %v3358_v0 = vsel %vm5238_vm12, %v3357_v11, %v4421_v52  ;;  %v3285_v32 = vsel %vm5239_vm11, %v3283_v30, %v5354_v2  ;;  %v1634_v5 = vrot.slane %v1626_v40, %v3685_v31  ;;  %v1642_v60 = vcombine.low %v1610_v3, %v4693_v45  ;;  %v5365_v21 = vld [vmem:[#allocation69_spill] sm:$0xff] }
 0x1e6   :  { %v2686_v54 = vpop.permute.xlu0 %2685  ;;  %v3328_v57 = vsel %vm5239_vm11, %v3327_v53, %v5352_v9  ;;  %v3359_v16 = vsel %vm5239_vm11, %v3358_v0, %v4424_v18  ;;  %v1643_v8 = vcombine.high %v1610_v3, %v4693_v45  ;;  %v1684_v30 = vrot.slane %v5366_v14, %v3671_v17  ;;  %v5369_v9 = vld [vmem:[#allocation33_spill] sm:$0xff] }
 0x1e7   :  { %v3386_v33 = vsel %vm5233_vm14, %v3385_v23, %v2686_v54  ;;  %v2690_v61 = vpop.permute.xlu1 %2689  ;;  %vm5242_vm14 = vcmask 654336   ;;  %v1658_v54 = vcombine.high %v1634_v5, %v3615_v27  ;;  %v1669_v53 = vrot.slane %v5367_v25, %v3671_v17  ;;  %v5371_v0 = vld [vmem:[#allocation53_spill] sm:$0xff] }
 0x1e8   :  { %2917 = vrot.lane.b32.xlu0 %v1593_v1, %s3626_s19  ;;  %v3387_v28 = vsel %vm5240_vm15, %v3386_v33, %v2690_v61  ;;  %v3287_v58 = vsel %vm5242_vm14, %v3285_v32, %v5355_v42  ;;  %v3329_v52 = vsel %vm5242_vm14, %v3328_v57, %v5356_v43  ;;  %v3360_v34 = vsel %vm5242_vm14, %v3359_v16, %v5358_v48  ;;  %v5361_v1 = vld [vmem:[#allocation31_spill] sm:$0xff] }
 0x1e9   :  { %2921 = vrot.lane.b32.xlu1 %v1584_v41, %s3627_s20  ;;  %v3330_v24 = vsel %vm5241_vm13, %v3329_v52, %v5357_v44  ;;  %v3289_v23 = vsel %vm5241_vm13, %v3287_v58, %v5360_v56  ;;  %v1641_v33 = vrot.slane %v1627_v6, %v3685_v31  ;;  %v5363_v61 = vld [vmem:[#allocation51_spill] sm:$0xff]  ;;  %v3361_v39 = vsel %vm5241_vm13, %v3360_v34, %v5364_v49  ;;  %v5372_v6 = vld [vmem:[#allocation70_spill] sm:$0xff] }
 0x1ea   :  { %v2694_v37 = vpop.permute.xlu0 %2693  ;;  %vm5245_vm15 = vcmask 818176   ;;  %v1677_v42 = vcombine.high %v5366_v14, %v3615_v27  ;;  %v5373_v58 = vld [vmem:[#allocation71_spill] sm:$0xff]  ;;  %v1662_v52 = vcombine.high %v5367_v25, %v3615_v27  ;;  %v1657_v44 = vrot.slane %v1643_v8, %v3685_v31  ;;  %v5382_v14 = vld [vmem:[#allocation57_spill] sm:$0xff] }
 0x1eb   :  { %v3388_v36 = vsel %vm5235_vm10, %v3387_v28, %v2694_v37  ;;  %v2698_v38 = vpop.permute.xlu1 %2697  ;;  %vm5244_vm10 = vcmask 719872   ;;  %v5368_v28 = vld [vmem:[#allocation32_spill] sm:$0xff]  ;;  %v1659_v45 = vcombine.high %v1641_v33, %v3615_v27  ;;  %v5377_v56 = vld [vmem:[#allocation55_spill] sm:$0xff] }
 0x1ec   :  { %2925 = vrot.lane.b32.xlu0 %v1594_v4, %s3628_s21  ;;  %v3389_v59 = vsel %vm5238_vm12, %v3388_v36, %v2698_v38  ;;  %vm5243_vm12 = vcmask 752640   ;;  %v3291_v18 = vsel %vm5244_vm10, %v3289_v23, %v5361_v1  ;;  %v3331_v12 = vsel %vm5244_vm10, %v3330_v24, %v5362_v35  ;;  %v5375_v24 = vld [vmem:[#allocation35_spill] sm:$0xff] }
 0x1ed   :  { %2929 = vrot.lane.b32.xlu1 %v1591_v63, %s5236_s22  ;;  %s5359_s22 = smov 60   ;;  %v3332_v51 = vsel %vm5243_vm12, %v3331_v12, %v5363_v61  ;;  %v3362_v63 = vsel %vm5244_vm10, %v3361_v39, %v5365_v21  ;;  %v3293_v37 = vsel %vm5243_vm12, %v3291_v18, %v5368_v28  ;;  %v1650_v4 = vrot.slane %v1642_v60, %v3685_v31  ;;  %v5379_v61 = vld [vmem:[#allocation36_spill] sm:$0xff]  ;;  %v5380_v39 = vld [vmem:[#allocation37_spill] sm:$0xff] }
 0x1ee   :  { %v2702_v50 = vpop.permute.xlu0 %2701  ;;  %v3363_v2 = vsel %vm5243_vm12, %v3362_v63, %v5372_v6  ;;  %v1691_v12 = vrot.slane %v1677_v42, %v3671_v17  ;;  %v1661_v63 = vcombine.high %v1657_v44, %v3615_v27 }
 0x1ef   :  { %v3390_v47 = vsel %vm5239_vm11, %v3389_v59, %v2702_v50  ;;  %v2706_v41 = vpop.permute.xlu1 %2705  ;;  %vm5246_vm11 = vcmask 785408   ;;  %v1692_v59 = vcombine.low %v1669_v53, %v1684_v30  ;;  %v5374_v50 = vld [vmem:[#allocation34_spill] sm:$0xff]  ;;  %v1660_v60 = vcombine.high %v1650_v4, %v3615_v27 }
 0x1f0   :  { %2933 = vrot.lane.b32.xlu0 %v1595_v19, %s5359_s22  ;;  %v3391_v62 = vsel %vm5242_vm14, %v3390_v47, %v2706_v41  ;;  %v3295_v57 = vsel %vm5246_vm11, %v3293_v37, %v5369_v9  ;;  %v3333_v11 = vsel %vm5246_vm11, %v3332_v51, %v5370_v22  ;;  %vm3300_vm14 = vcmask 883712   ;;  %v5376_v47 = vld [vmem:[#allocation54_spill] sm:$0xff]  ;;  %v5383_v9 = vld [vmem:[#allocation5_spill] sm:$0xff] }
 0x1f1   :  { %2937 = vrot.lane.b32.xlu1 %v1634_v5, %s3631_s24  ;;  %v3334_v3 = vsel %vm5245_vm15, %v3333_v11, %v5371_v0  ;;  %v3364_v43 = vsel %vm5246_vm11, %v3363_v2, %v5373_v58  ;;  %v3297_v19 = vsel %vm5245_vm15, %v3295_v57, %v5374_v50  ;;  %v1700_v49 = vrot.slane %v1692_v59, %v3685_v31  ;;  %v5384_v22 = vld [vmem:[#allocation38_spill] sm:$0xff]  ;;  %v5387_v2 = vld [vmem:[#allocation9_spill] sm:$0xff] }
 0x1f2   :  { %v2710_v46 = vpop.permute.xlu0 %2709  ;;  %v1750_v57 = vrot.slane %v5383_v9, %v3671_v17 }
 0x1f3   :  { %v3392_v26 = vsel %vm5241_vm13, %v3391_v62, %v2710_v46  ;;  %v2714_v40 = vpop.permute.xlu1 %2713  ;;  %vm3298_vm13 = vcmask 850944   ;;  %v1676_v46 = vrot.slane %v1662_v52, %v3671_v17  ;;  %v1724_v6 = vcombine.high %v1700_v49, %v3615_v27 }
 0x1f4   :  { %2941 = vrot.lane.b32.xlu0 %v1658_v54, %s3632_s25  ;;  %v3393_v36 = vsel %vm5244_vm10, %v3392_v26, %v2714_v40  ;;  %v3299_v16 = vsel %vm3298_vm13, %v3297_v19, %v5375_v24  ;;  %v3335_v41 = vsel %vm3298_vm13, %v3334_v3, %v5376_v47  ;;  %v5378_v54 = vld [vmem:[#allocation72_spill] sm:$0xff]  ;;  %vm5257_vm10 = vcmask 949248  }
 0x1f5   :  { %2945 = vrot.lane.b32.xlu1 %v1641_v33, %s5330_s23  ;;  %v3336_v23 = vsel %vm3300_vm14, %v3335_v41, %v5377_v56  ;;  %v3365_v1 = vsel %vm5245_vm15, %v3364_v43, %v5378_v54  ;;  %v1693_v33 = vcombine.high %v1669_v53, %v1684_v30  ;;  %v3301_v51 = vsel %vm3300_vm14, %v3299_v16, %v5379_v61  ;;  %v5381_v40 = vld [vmem:[#allocation56_spill] sm:$0xff] }
 0x1f6   :  { %v2718_v38 = vpop.permute.xlu0 %2717  ;;  %v3366_v62 = vsel %vm3298_vm13, %v3365_v1, %v4463_v10  ;;  %v1709_v50 = vcombine.high %v1676_v46, %v1691_v12  ;;  %v1743_v19 = vcombine.high %v5383_v9, %v3615_v27 }
 0x1f7   :  { %v3394_v32 = vsel %vm5243_vm12, %v3393_v36, %v2718_v38  ;;  %v2722_v5 = vpop.permute.xlu1 %2721  ;;  %vm3302_vm12 = vcmask 916480   ;;  %v3367_v25 = vsel %vm3300_vm14, %v3366_v62, %v4466_v13  ;;  %v1707_v13 = vrot.slane %v1693_v33, %v3685_v31  ;;  %v5385_v36 = vld [vmem:[#allocation39_spill] sm:$0xff]  ;;  %v5390_v62 = vld [vmem:[#allocation60_spill] sm:$0xff] }
 0x1f8   :  { %2949 = vrot.lane.b32.xlu0 %v1659_v45, %s3634_s27  ;;  %v3395_v48 = vsel %vm5246_vm11, %v3394_v32, %v2722_v5  ;;  %v3303_v26 = vsel %vm3302_vm12, %v3301_v51, %v5380_v39  ;;  %v3337_v8 = vsel %vm3302_vm12, %v3336_v23, %v5381_v40  ;;  %vm5255_vm11 = vcmask 1014784   ;;  %v5386_v45 = vld [vmem:[#allocation58_spill] sm:$0xff]  ;;  %v5388_v5 = vld [vmem:[#allocation59_spill] sm:$0xff] }
 0x1f9   :  { %2953 = vrot.lane.b32.xlu1 %v1650_v4, %s3635_s28  ;;  %v3338_v30 = vsel %vm5257_vm10, %v3337_v8, %v5382_v14  ;;  %v3368_v37 = vsel %vm3302_vm12, %v3367_v25, %v4475_v15  ;;  %v1708_v4 = vcombine.low %v1676_v46, %v1691_v12  ;;  %v3305_v11 = vsel %vm5257_vm10, %v3303_v26, %v5384_v22  ;;  %v5392_v22 = vld [vmem:[#allocation11_spill] sm:$0xff] }
 0x1fa   :  { %v2726_v34 = vpop.permute.xlu0 %2725  ;;  %v1735_v32 = vrot.slane %v5387_v2, %v3671_v17  ;;  %v3369_v58 = vsel %vm5257_vm10, %v3368_v37, %v4477_v55  ;;  %v1725_v41 = vcombine.high %v1707_v13, %v3615_v27  ;;  %v1757_v1 = vrot.slane %v1743_v19, %v3671_v17  ;;  %v5391_v37 = vld [vmem:[#allocation7_spill] sm:$0xff] }
 0x1fb   :  { %v3396_v18 = vsel %vm5245_vm15, %v3395_v48, %v2726_v34  ;;  %v2730_v35 = vpop.permute.xlu1 %2729  ;;  %vm5256_vm15 = vcmask 982016   ;;  %v1716_v48 = vrot.slane %v1708_v4, %v3685_v31  ;;  %v1816_v4 = vrot.slane %v5391_v37, %v3671_v17 }
 0x1fc   :  { %2957 = vrot.lane.b32.xlu0 %v1660_v60, %s5313_s26  ;;  %v3397_v10 = vsel %vm3298_vm13, %v3396_v18, %v2730_v35  ;;  %v3307_v38 = vsel %vm5256_vm15, %v3305_v11, %v5385_v36  ;;  %v3339_v0 = vsel %vm5256_vm15, %v3338_v30, %v5386_v45  ;;  %v3370_v59 = vsel %vm5256_vm15, %v3369_v58, %v4489_v29 }
 0x1fd   :  { %2961 = vrot.lane.b32.xlu1 %v1657_v44, %s3637_s30  ;;  %v3340_v42 = vsel %vm5255_vm11, %v3339_v0, %v5388_v5  ;;  %v5389_v44 = vld [vmem:[#allocation40_spill] sm:$0xff]  ;;  %v1728_v29 = vcombine.high %v5387_v2, %v3615_v27  ;;  %v1758_v34 = vcombine.low %v1735_v32, %v1750_v57  ;;  %v3371_v60 = vsel %vm5255_vm11, %v3370_v59, %v4496_v20 }
 0x1fe   :  { %v2734_v21 = vpop.permute.xlu0 %2733  ;;  %v3309_v24 = vsel %vm5255_vm11, %v3307_v38, %v5389_v44  ;;  %v1723_v18 = vrot.slane %v1709_v50, %v3685_v31  ;;  %v1726_v33 = vcombine.high %v1716_v48, %v3615_v27  ;;  %v1759_v51 = vcombine.high %v1735_v32, %v1750_v57 }
 0x1ff   :  { %v3398_v53 = vsel %vm3300_vm14, %v3397_v10, %v2734_v21  ;;  %v2738_v28 = vpop.permute.xlu1 %2737  ;;  %v3535_v16 = vcombine.low %v3309_v24, %v3340_v42  ;;  %v1742_v61 = vrot.slane %v1728_v29, %v3671_v17  ;;  %v1801_v11 = vrot.slane %v5392_v22, %v3671_v17 }
 0x200   :  { %2965 = vrot.lane.b32.xlu0 %v1661_v63, %s3638_s2  ;;  %v3399_v15 = vsel %vm3302_vm12, %v3398_v53, %v2738_v28  ;;  %v1727_v21 = vcombine.high %v1723_v18, %v3615_v27  ;;  %v1773_v53 = vrot.slane %v1759_v51, %v3685_v31  ;;  %v1809_v0 = vcombine.high %v5391_v37, %v3615_v27 }
 0x201   :  { %2969 = vrot.lane.b32.xlu1 %v1700_v49, %s5296_s29  ;;  %v3543_v35 = vrot.slane %v3535_v16, %v3671_v17  ;;  %v4849_v49 = vrot.slane %v1758_v34, %v3685_v31  ;;  %v1774_v63 = vcombine.low %v1742_v61, %v1757_v1  ;;  %v1775_v28 = vcombine.high %v1742_v61, %v1757_v1  ;;  %v5396_v1 = vld [vmem:[#allocation17_spill] sm:$0xff] }
 0x202   :  { %v2742_v3 = vpop.permute.xlu0 %2741  ;;  %v1791_v38 = vcombine.high %v1773_v53, %v3615_v27  ;;  %v1824_v2 = vcombine.low %v1801_v11, %v1816_v4  ;;  %v1825_v19 = vcombine.high %v1801_v11, %v1816_v4 }
 0x203   :  { %v3400_v43 = vsel %vm5257_vm10, %v3399_v15, %v2742_v3  ;;  %v2746_v52 = vpop.permute.xlu1 %2745  ;;  %v1790_v25 = vcombine.high %v4849_v49, %v3615_v27  ;;  %v1782_v45 = vrot.slane %v1774_v63, %v3685_v31  ;;  %v1794_v15 = vcombine.high %v5392_v22, %v3615_v27 }
 0x204   :  { %2973 = vrot.lane.b32.xlu0 %v1724_v6, %s3640_s4  ;;  %v3401_v55 = vsel %vm5256_vm15, %v3400_v43, %v2746_v52  ;;  %v1789_v58 = vrot.slane %v1775_v28, %v3685_v31  ;;  %v1823_v43 = vrot.slane %v1809_v0, %v3671_v17 }
 0x205   :  { %2977 = vrot.lane.b32.xlu1 %v1707_v13, %s5249_s5  ;;  %v1792_v42 = vcombine.high %v1782_v45, %v3615_v27  ;;  %v1808_v52 = vrot.slane %v1794_v15, %v3671_v17  ;;  %s5403_s5 = smov 56  }
 0x206   :  { %v2750_v47 = vpop.permute.xlu0 %2749  ;;  %v1793_v16 = vcombine.high %v1789_v58, %v3615_v27 }
 0x207   :  { %v3402_v56 = vsel %vm5255_vm11, %v3401_v55, %v2750_v47  ;;  %v2754_v23 = vpop.permute.xlu1 %2753  ;;  %v1832_v55 = vrot.slane %v1824_v2, %v3685_v31 }
 0x208   :  { %v3536_v54 = vcombine.low %v3371_v60, %v3402_v56  ;;  %2981 = vrot.lane.b32.xlu0 %v1725_v41, %s5247_s6  ;;  %v3403_v46 = vsel %vm3248_vm0, %v5390_v62, %v2754_v23  ;;  %v1839_v56 = vrot.slane %v1825_v19, %v3685_v31  ;;  %v5395_v23 = vld [vmem:[#allocation12_spill] sm:$0xff]  ;;  %v1841_v62 = vcombine.high %v1808_v52, %v1823_v43 }
 0x209   :  { %2985 = vrot.lane.b32.xlu1 %v1716_v48, %s5277_s3  ;;  %v1840_v48 = vcombine.low %v1808_v52, %v1823_v43  ;;  %v1856_v60 = vcombine.high %v1832_v55, %v3615_v27  ;;  %v2007_v51 = vcombine.high %v5395_v23, %v3615_v27 }
 0x20a   :  { %v3550_v12 = vrot.slane %v3536_v54, %v3671_v17  ;;  %v2758_v20 = vpop.permute.xlu0 %2757  ;;  %v2014_v54 = vrot.slane %v5395_v23, %v3671_v17 }
 0x20b   :  { %v3404_v39 = vsel %vm3250_vm1, %v3403_v46, %v2758_v20  ;;  %v2762_v26 = vpop.permute.xlu1 %2761  ;;  %v1848_v61 = vrot.slane %v1840_v48, %v3685_v31 }
 0x20c   :  { %v3551_v40 = vcombine.low %v3543_v35, %v3550_v12  ;;  %2989 = vrot.lane.b32.xlu0 %v1726_v33, %s3644_s8  ;;  %v3405_v8 = vsel %vm3252_vm2, %v3404_v39, %v2762_v26  ;;  %v1857_v33 = vcombine.high %v1839_v56, %v3615_v27  ;;  %v1992_v39 = vcombine.high %v5396_v1, %v3615_v27 }
 0x20d   :  { %2993 = vrot.lane.b32.xlu1 %v1723_v18, %s3645_s9  ;;  %v1999_v18 = vrot.slane %v5396_v1, %v3671_v17  ;;  %v1858_v63 = vcombine.high %v1848_v61, %v3615_v27 }
 0x20e   :  { %3571 = vst [vmem:[%s5198_s1] sm:$0xff] %v3551_v40  ;;  %v2766_v10 = vpop.permute.xlu0 %2765 }
 0x20f   :  { %v3406_v14 = vsel %vm3254_vm3, %v3405_v8, %v2766_v10  ;;  %v2770_v30 = vpop.permute.xlu1 %2769  ;;  %v2022_v26 = vcombine.low %v1999_v18, %v2014_v54 }
 0x210   :  { %2997 = vrot.lane.b32.xlu0 %v1727_v21, %s3646_s7  ;;  %v3407_v9 = vsel %vm3256_vm4, %v3406_v14, %v2770_v30  ;;  %v1855_v14 = vrot.slane %v1841_v62, %v3685_v31  ;;  %v2021_v30 = vrot.slane %v2007_v51, %v3671_v17 }
 0x211   :  { %3001 = vrot.lane.b32.xlu1 %v1790_v25, %s3619_s12  ;;  %v2006_v25 = vrot.slane %v1992_v39, %v3671_v17  ;;  %v4922_v28 = vrot.slane %v2022_v26, %v3685_v31 }
 0x212   :  { %v2774_v57 = vpop.permute.xlu0 %2773  ;;  %v1859_v22 = vcombine.high %v1855_v14, %v3615_v27 }
 0x213   :  { %v3408_v13 = vsel %vm3258_vm5, %v3407_v9, %v2774_v57  ;;  %v2778_v36 = vpop.permute.xlu1 %2777  ;;  %v2038_v11 = vcombine.low %v2006_v25, %v2021_v30 }
 0x214   :  { %3005 = vrot.lane.b32.xlu0 %v1773_v53, %s3616_s0  ;;  %v3409_v3 = vsel %vm5252_vm6, %v3408_v13, %v2778_v36  ;;  %vm5394_vm6 = vcmask 392192   ;;  %v2023_v53 = vcombine.high %v1999_v18, %v2014_v54 }
 0x215   :  { %3009 = vrot.lane.b32.xlu1 %v1791_v38, %s3617_s10  ;;  %v2054_v38 = vcombine.high %v4922_v28, %v3615_v27  ;;  %v2046_v52 = vrot.slane %v2038_v11, %v3685_v31 }
 0x216   :  { %v2782_v6 = vpop.permute.xlu0 %2781 }
 0x217   :  { %v3410_v32 = vsel %vm5251_vm7, %v3409_v3, %v2782_v6  ;;  %v2786_v5 = vpop.permute.xlu1 %2785  ;;  %vm5393_vm7 = vcmask 359424   ;;  %v2039_v3 = vcombine.high %v2006_v25, %v2021_v30  ;;  %v5406_v6 = vld [vmem:[#allocation14_spill] sm:$0xff]  ;;  %v5414_v30 = vld [vmem:[#allocation13_spill] sm:$0xff] }
 0x218   :  { %3013 = vrot.lane.b32.xlu0 %v1782_v45, %s3618_s11  ;;  %v3411_v59 = vsel %vm5254_vm8, %v3410_v32, %v2786_v5  ;;  %v2037_v45 = vrot.slane %v2023_v53, %v3685_v31  ;;  %v2080_v2 = vrot.slane %v5406_v6, %v3671_v17  ;;  %v5407_v32 = vld [vmem:[#allocation19_spill] sm:$0xff]  ;;  %v2073_v19 = vcombine.high %v5406_v6, %v3615_v27 }
 0x219   :  { %3017 = vrot.lane.b32.xlu1 %v1792_v42, %s3620_s13  ;;  %v2065_v5 = vrot.slane %v5407_v32, %v3671_v17  ;;  %v1867_v25 = vrot.slane %v5414_v30, %v3671_v17 }
 0x21a   :  { %v2790_v50 = vpop.permute.xlu0 %2789  ;;  %v2055_v43 = vcombine.high %v2037_v45, %v3615_v27 }
 0x21b   :  { %v3412_v44 = vsel %vm5253_vm9, %v3411_v59, %v2790_v50  ;;  %v2794_v24 = vpop.permute.xlu1 %2793  ;;  %vm5404_vm9 = vcmask 621568  }
 0x21c   :  { %3021 = vrot.lane.b32.xlu0 %v1789_v58, %s3621_s14  ;;  %v3413_v47 = vsel %vm5393_vm7, %v3412_v44, %v2794_v24  ;;  %vm5397_vm7 = vcmask 424960   ;;  %v2058_v44 = vcombine.high %v5407_v32, %v3615_v27  ;;  %v2088_v24 = vcombine.low %v2065_v5, %v2080_v2 }
 0x21d   :  { %3025 = vrot.lane.b32.xlu1 %v1793_v16, %s3622_s15 }
 0x21e   :  { %v2798_v41 = vpop.permute.xlu0 %2797  ;;  %v2096_v18 = vrot.slane %v2088_v24, %v3685_v31 }
 0x21f   :  { %v3414_v29 = vsel %vm5394_vm6, %v3413_v47, %v2798_v41  ;;  %v2802_v34 = vpop.permute.xlu1 %2801  ;;  %vm5398_vm6 = vcmask 457728   ;;  %v2056_v47 = vcombine.high %v2046_v52, %v3615_v27  ;;  %v2053_v41 = vrot.slane %v2039_v3, %v3685_v31 }
 0x220   :  { %3029 = vrot.lane.b32.xlu0 %v1832_v55, %s3623_s16  ;;  %v3415_v35 = vsel %vm5397_vm7, %v3414_v29, %v2802_v34  ;;  %vm5399_vm7 = vcmask 490496   ;;  %v2087_v34 = vrot.slane %v2073_v19, %v3671_v17 }
 0x221   :  { %3033 = vrot.lane.b32.xlu1 %v1856_v60, %s3624_s17  ;;  %v2072_v60 = vrot.slane %v2058_v44, %v3671_v17  ;;  %v2057_v1 = vcombine.high %v2053_v41, %v3615_v27 }
 0x222   :  { %v2806_v12 = vpop.permute.xlu0 %2805 }
 0x223   :  { %v3416_v46 = vsel %vm5398_vm6, %v3415_v35, %v2806_v12  ;;  %v2810_v20 = vpop.permute.xlu1 %2809  ;;  %vm5400_vm6 = vcmask 523264   ;;  %v2104_v62 = vcombine.low %v2072_v60, %v2087_v34 }
 0x224   :  { %3037 = vrot.lane.b32.xlu0 %v1839_v56, %s3625_s18  ;;  %v3417_v40 = vsel %vm5399_vm7, %v3416_v46, %v2810_v20  ;;  %vm5401_vm7 = vcmask 556032   ;;  %v2089_v56 = vcombine.high %v2065_v5, %v2080_v2 }
 0x225   :  { %3041 = vrot.lane.b32.xlu1 %v1857_v33, %s3626_s19  ;;  %v2120_v33 = vcombine.high %v2096_v18, %v3615_v27 }
 0x226   :  { %v2814_v8 = vpop.permute.xlu0 %2813 }
 0x227   :  { %v3418_v10 = vsel %vm5400_vm6, %v3417_v40, %v2814_v8  ;;  %v2818_v21 = vpop.permute.xlu1 %2817  ;;  %vm5402_vm6 = vcmask 588800   ;;  %v2105_v40 = vcombine.high %v2072_v60, %v2087_v34 }
 0x228   :  { %3045 = vrot.lane.b32.xlu0 %v1848_v61, %s3627_s20  ;;  %v3419_v37 = vsel %vm5401_vm7, %v3418_v10, %v2818_v21  ;;  %vm5405_vm7 = vcmask 654336   ;;  %v2103_v61 = vrot.slane %v2089_v56, %v3685_v31  ;;  %v2112_v21 = vrot.slane %v2104_v62, %v3685_v31 }
 0x229   :  { %3049 = vrot.lane.b32.xlu1 %v1858_v63, %s3628_s21  ;;  %v5413_v63 = vld [vmem:[#allocation8_spill] sm:$0xff] }
 0x22a   :  { %v2822_v4 = vpop.permute.xlu0 %2821  ;;  %v2121_v10 = vcombine.high %v2103_v61, %v3615_v27 }
 0x22b   :  { %v3420_v9 = vsel %vm5402_vm6, %v3419_v37, %v2822_v4  ;;  %v2826_v57 = vpop.permute.xlu1 %2825  ;;  %vm5409_vm6 = vcmask 719872  }
 0x22c   :  { %3053 = vrot.lane.b32.xlu0 %v1855_v14, %s5403_s5  ;;  %v3421_v13 = vsel %vm5404_vm9, %v3420_v9, %v2826_v57  ;;  %vm5408_vm9 = vcmask 687104   ;;  %v1882_v14 = vrot.slane %v5413_v63, %v3671_v17  ;;  %v5415_v9 = vld [vmem:[#allocation16_spill] sm:$0xff] }
 0x22d   :  { %3057 = vrot.lane.b32.xlu1 %v1859_v22, %s5359_s22  ;;  %v2146_v57 = vrot.slane %v5415_v9, %v3671_v17  ;;  %v5416_v22 = vld [vmem:[#allocation20_spill] sm:$0xff] }
 0x22e   :  { %v2830_v36 = vpop.permute.xlu0 %2829  ;;  %v2131_v11 = vrot.slane %v5416_v22, %v3671_v17  ;;  %v1891_v19 = vcombine.high %v1867_v25, %v1882_v14 }
 0x22f   :  { %v3422_v0 = vsel %vm5405_vm7, %v3421_v13, %v2830_v36  ;;  %v2834_v15 = vpop.permute.xlu1 %2833  ;;  %vm5410_vm7 = vcmask 752640   ;;  %v2122_v36 = vcombine.high %v2112_v21, %v3615_v27 }
 0x230   :  { %3125 = vrot.lane.b32.xlu0 %v2054_v38, %s3619_s12  ;;  %v3423_v42 = vsel %vm5408_vm9, %v3422_v0, %v2834_v15  ;;  %vm5411_vm9 = vcmask 785408   ;;  %v2119_v38 = vrot.slane %v2105_v40, %v3685_v31  ;;  %v2154_v6 = vcombine.low %v2131_v11, %v2146_v57 }
 0x231   :  { %3129 = vrot.lane.b32.xlu1 %v2037_v45, %s3616_s0  ;;  %v1890_v45 = vcombine.low %v1867_v25, %v1882_v14  ;;  %s5438_s0 = smov 104  }
 0x232   :  { %v2838_v58 = vpop.permute.xlu0 %2837  ;;  %v2123_v32 = vcombine.high %v2119_v38, %v3615_v27 }
 0x233   :  { %v3424_v59 = vsel %vm5409_vm6, %v3423_v42, %v2838_v58  ;;  %v2842_v50 = vpop.permute.xlu1 %2841  ;;  %vm5412_vm6 = vcmask 818176   ;;  %v1898_v58 = vrot.slane %v1890_v45, %v3685_v31 }
 0x234   :  { %3133 = vrot.lane.b32.xlu0 %v2055_v43, %s3617_s10  ;;  %v3425_v16 = vsel %vm5410_vm7, %v3424_v59, %v2842_v50  ;;  %v2162_v59 = vrot.slane %v2154_v6, %v3685_v31  ;;  %v1860_v50 = vcombine.high %v5414_v30, %v3615_v27  ;;  %vm5417_vm7 = vcmask 228352   ;;  %s5440_s10 = smov 108  }
 0x235   :  { %3137 = vrot.lane.b32.xlu1 %v2046_v52, %s3618_s11 }
 0x236   :  { %v2846_v55 = vpop.permute.xlu0 %2845  ;;  %v2186_v34 = vcombine.high %v2162_v59, %v3615_v27  ;;  %v1874_v56 = vrot.slane %v1860_v50, %v3671_v17 }
 0x237   :  { %v3426_v48 = vsel %vm5411_vm9, %v3425_v16, %v2846_v55  ;;  %v2850_v29 = vpop.permute.xlu1 %2849  ;;  %v1922_v16 = vcombine.high %v1898_v58, %v3615_v27  ;;  %vm5418_vm9 = vcmask 261120  }
 0x238   :  { %3141 = vrot.lane.b32.xlu0 %v2056_v47, %s3620_s13  ;;  %v3427_v23 = vsel %vm5412_vm6, %v3426_v48, %v2850_v29  ;;  %v2139_v47 = vcombine.high %v5415_v9, %v3615_v27  ;;  %v2155_v48 = vcombine.high %v2131_v11, %v2146_v57  ;;  %vm5419_vm6 = vcmask 326656  }
 0x239   :  { %3145 = vrot.lane.b32.xlu1 %v2053_v41, %s3621_s14  ;;  %v2124_v41 = vcombine.high %v5416_v22, %v3615_v27 }
 0x23a   :  { %v2854_v54 = vpop.permute.xlu0 %2853 }
 0x23b   :  { %v3428_v35 = vsel %vm3298_vm13, %v3427_v23, %v2854_v54  ;;  %v2858_v12 = vpop.permute.xlu1 %2857 }
 0x23c   :  { %3149 = vrot.lane.b32.xlu0 %v2057_v1, %s3622_s15  ;;  %v3429_v46 = vsel %vm3300_vm14, %v3428_v35, %v2858_v12  ;;  %v1905_v1 = vrot.slane %v1891_v19, %v3685_v31  ;;  %v2153_v35 = vrot.slane %v2139_v47, %v3671_v17  ;;  %v2138_v12 = vrot.slane %v2124_v41, %v3671_v17 }
 0x23d   :  { %3153 = vrot.lane.b32.xlu1 %v2096_v18, %s3623_s16 }
 0x23e   :  { %v2862_v20 = vpop.permute.xlu0 %2861  ;;  %v2171_v11 = vcombine.high %v2138_v12, %v2153_v35 }
 0x23f   :  { %v3430_v51 = vsel %vm3302_vm12, %v3429_v46, %v2862_v20  ;;  %v2866_v39 = vpop.permute.xlu1 %2865  ;;  %v2169_v46 = vrot.slane %v2155_v48, %v3685_v31 }
 0x240   :  { %v3431_v26 = vsel %vm5257_vm10, %v3430_v51, %v2866_v39  ;;  %3157 = vrot.lane.b32.xlu0 %v2120_v33, %s3624_s17  ;;  %v1923_v51 = vcombine.high %v1905_v1, %v3615_v27 }
 0x241   :  { %3161 = vrot.lane.b32.xlu1 %v2103_v61, %s3625_s18 }
 0x242   :  { %v2870_v8 = vpop.permute.xlu0 %2869 }
 0x243   :  { %v3432_v53 = vsel %vm5256_vm15, %v3431_v26, %v2870_v8  ;;  %v2874_v37 = vpop.permute.xlu1 %2873  ;;  %v2170_v26 = vcombine.low %v2138_v12, %v2153_v35  ;;  %v2187_v8 = vcombine.high %v2169_v46, %v3615_v27 }
 0x244   :  { %v4979_v4 = vsel %vm5255_vm11, %v3432_v53, %v2874_v37  ;;  %3165 = vrot.lane.b32.xlu0 %v2121_v10, %s3626_s19 }
 0x245   :  { %3169 = vrot.lane.b32.xlu1 %v2112_v21, %s3627_s20  ;;  %v2178_v25 = vrot.slane %v2170_v26, %v3685_v31 }
 0x246   :  { %v2878_v13 = vpop.permute.xlu0 %2877 }
 0x247   :  { %v3434_v0 = vsel %vm3248_vm0, %v4528_v7, %v2878_v13  ;;  %v2882_v15 = vpop.permute.xlu1 %2881  ;;  %v1875_v7 = vcombine.high %v5413_v63, %v3615_v27 }
 0x248   :  { %v3435_v3 = vsel %vm3250_vm1, %v3434_v0, %v2882_v15  ;;  %3173 = vrot.lane.b32.xlu0 %v2122_v36, %s3628_s21  ;;  %v2188_v36 = vcombine.high %v2178_v25, %v3615_v27  ;;  %v5425_v0 = vld [vmem:[#allocation15_spill] sm:$0xff] }
 0x249   :  { %3177 = vrot.lane.b32.xlu1 %v2119_v38, %s5403_s5  ;;  %v1889_v60 = vrot.slane %v1875_v7, %v3671_v17  ;;  %v5424_v38 = vld [vmem:[#allocation10_spill] sm:$0xff]  ;;  %v1933_v15 = vrot.slane %v5425_v0, %v3671_v17 }
 0x24a   :  { %v2886_v2 = vpop.permute.xlu0 %2885  ;;  %v1948_v45 = vrot.slane %v5424_v38, %v3671_v17 }
 0x24b   :  { %v3436_v5 = vsel %vm3252_vm2, %v3435_v3, %v2886_v2  ;;  %v2890_v42 = vpop.permute.xlu1 %2889  ;;  %v1906_v20 = vcombine.low %v1874_v56, %v1889_v60  ;;  %v1907_v53 = vcombine.high %v1874_v56, %v1889_v60  ;;  %v1941_v60 = vcombine.high %v5424_v38, %v3615_v27 }
 0x24c   :  { %v3437_v43 = vsel %vm3254_vm3, %v3436_v5, %v2890_v42  ;;  %3181 = vrot.lane.b32.xlu0 %v2123_v32, %s5359_s22  ;;  %v5428_v5 = vld [vmem:[#allocation18_spill] sm:$0xff] }
 0x24d   :  { %3061 = vrot.lane.b32.xlu1 %v1898_v58, %s3631_s24  ;;  %v1914_v63 = vrot.slane %v1906_v20, %v3685_v31  ;;  %v1921_v2 = vrot.slane %v1907_v53, %v3685_v31  ;;  %v2212_v42 = vrot.slane %v5428_v5, %v3671_v17  ;;  %v5429_v58 = vld [vmem:[#allocation21_spill] sm:$0xff] }
 0x24e   :  { %v2894_v52 = vpop.permute.xlu0 %2893  ;;  %v2190_v20 = vcombine.high %v5429_v58, %v3615_v27 }
 0x24f   :  { %v3438_v44 = vsel %vm3256_vm4, %v3437_v43, %v2894_v52  ;;  %v2898_v24 = vpop.permute.xlu1 %2897  ;;  %v1924_v57 = vcombine.high %v1914_v63, %v3615_v27  ;;  %v2197_v43 = vrot.slane %v5429_v58, %v3671_v17  ;;  %v2185_v52 = vrot.slane %v2171_v11, %v3685_v31 }
 0x250   :  { %v3439_v55 = vsel %vm3258_vm5, %v3438_v44, %v2898_v24  ;;  %3185 = vrot.lane.b32.xlu0 %v2162_v59, %s3631_s24  ;;  %v1956_v59 = vcombine.low %v1933_v15, %v1948_v45  ;;  %v1925_v44 = vcombine.high %v1921_v2, %v3615_v27 }
 0x251   :  { %3065 = vrot.lane.b32.xlu1 %v1922_v16, %s3632_s25  ;;  %v2220_v16 = vcombine.low %v2197_v43, %v2212_v42  ;;  %v2189_v47 = vcombine.high %v2185_v52, %v3615_v27 }
 0x252   :  { %v2902_v29 = vpop.permute.xlu0 %2901 }
 0x253   :  { %v3440_v23 = vsel %vm5417_vm7, %v3439_v55, %v2902_v29  ;;  %v2906_v54 = vpop.permute.xlu1 %2905  ;;  %vm5420_vm7 = vcmask 359424   ;;  %v1964_v29 = vrot.slane %v1956_v59, %v3685_v31 }
 0x254   :  { %v3441_v18 = vsel %vm5418_vm9, %v3440_v23, %v2906_v54  ;;  %3189 = vrot.lane.b32.xlu0 %v2186_v34, %s3632_s25  ;;  %vm5421_vm9 = vcmask 392192   ;;  %v2228_v23 = vrot.slane %v2220_v16, %v3685_v31  ;;  %v1926_v54 = vcombine.high %v5425_v0, %v3615_v27 }
 0x255   :  { %3069 = vrot.lane.b32.xlu1 %v1905_v1, %s5330_s23  ;;  %v1957_v1 = vcombine.high %v1933_v15, %v1948_v45  ;;  %v1988_v12 = vcombine.high %v1964_v29, %v3615_v27 }
 0x256   :  { %v2910_v62 = vpop.permute.xlu0 %2909  ;;  %v1940_v26 = vrot.slane %v1926_v54, %v3671_v17 }
 0x257   :  { %v3442_v33 = vsel %vm5254_vm8, %v3441_v18, %v2910_v62  ;;  %v2914_v61 = vpop.permute.xlu1 %2913  ;;  %vm5423_vm8 = vcmask 457728  }
 0x258   :  { %v3443_v39 = vsel %vm5419_vm6, %v3442_v33, %v2914_v61  ;;  %3193 = vrot.lane.b32.xlu0 %v2169_v46, %s5330_s23  ;;  %vm5422_vm6 = vcmask 424960   ;;  %v2205_v46 = vcombine.high %v5428_v5, %v3615_v27  ;;  %v2221_v33 = vcombine.high %v2197_v43, %v2212_v42 }
 0x259   :  { %3073 = vrot.lane.b32.xlu1 %v1923_v51, %s3634_s27  ;;  %v2252_v51 = vcombine.high %v2228_v23, %v3615_v27 }
 0x25a   :  { %v2918_v40 = vpop.permute.xlu0 %2917 }
 0x25b   :  { %v3444_v10 = vsel %vm5420_vm7, %v3443_v39, %v2918_v40  ;;  %v2922_v21 = vpop.permute.xlu1 %2921  ;;  %vm5426_vm7 = vcmask 490496   ;;  %v1955_v39 = vrot.slane %v1941_v60, %v3671_v17 }
 0x25c   :  { %v3445_v14 = vsel %vm5421_vm9, %v3444_v10, %v2922_v21  ;;  %3197 = vrot.lane.b32.xlu0 %v2187_v8, %s3634_s27  ;;  %vm5430_vm9 = vcmask 556032   ;;  %v1971_v10 = vrot.slane %v1957_v1, %v3685_v31 }
 0x25d   :  { %3077 = vrot.lane.b32.xlu1 %v1914_v63, %s3635_s28  ;;  %v2219_v63 = vrot.slane %v2205_v46, %v3671_v17  ;;  %v1972_v53 = vcombine.low %v1940_v26, %v1955_v39 }
 0x25e   :  { %v2926_v30 = vpop.permute.xlu0 %2925 }
 0x25f   :  { %v3446_v37 = vsel %vm5422_vm6, %v3445_v14, %v2926_v30  ;;  %v2930_v9 = vpop.permute.xlu1 %2929  ;;  %vm5431_vm6 = vcmask 588800   ;;  %v2204_v14 = vrot.slane %v2190_v20, %v3671_v17  ;;  %v1980_v0 = vrot.slane %v1972_v53, %v3685_v31 }
 0x260   :  { %v3447_v22 = vsel %vm5423_vm8, %v3446_v37, %v2930_v9  ;;  %3201 = vrot.lane.b32.xlu0 %v2178_v25, %s3635_s28  ;;  %vm5427_vm8 = vcmask 523264   ;;  %v2235_v25 = vrot.slane %v2221_v33, %v3685_v31 }
 0x261   :  { %3081 = vrot.lane.b32.xlu1 %v1924_v57, %s5313_s26  ;;  %v1989_v57 = vcombine.high %v1971_v10, %v3615_v27  ;;  %v2236_v11 = vcombine.low %v2204_v14, %v2219_v63  ;;  %v1990_v42 = vcombine.high %v1980_v0, %v3615_v27  ;;  %v2237_v43 = vcombine.high %v2204_v14, %v2219_v63 }
 0x262   :  { %v2934_v13 = vpop.permute.xlu0 %2933 }
 0x263   :  { %v3448_v3 = vsel %vm5426_vm7, %v3447_v22, %v2934_v13  ;;  %v2938_v6 = vpop.permute.xlu1 %2937  ;;  %vm5432_vm7 = vcmask 621568  }
 0x264   :  { %v3449_v32 = vsel %vm5427_vm8, %v3448_v3, %v2938_v6  ;;  %3205 = vrot.lane.b32.xlu0 %v2188_v36, %s5313_s26  ;;  %vm5433_vm8 = vcmask 654336   ;;  %v2253_v36 = vcombine.high %v2235_v25, %v3615_v27  ;;  %v2244_v6 = vrot.slane %v2236_v11, %v3685_v31 }
 0x265   :  { %3085 = vrot.lane.b32.xlu1 %v1921_v2, %s3637_s30  ;;  %v1973_v2 = vcombine.high %v1940_v26, %v1955_v39 }
 0x266   :  { %v2942_v7 = vpop.permute.xlu0 %2941 }
 0x267   :  { %v3450_v50 = vsel %vm5430_vm9, %v3449_v32, %v2942_v7  ;;  %v2946_v19 = vpop.permute.xlu1 %2945  ;;  %vm5434_vm9 = vcmask 687104  }
 0x268   :  { %v3451_v24 = vsel %vm5431_vm6, %v3450_v50, %v2946_v19  ;;  %3209 = vrot.lane.b32.xlu0 %v2185_v52, %s3637_s30  ;;  %vm5435_vm6 = vcmask 719872   ;;  %v2254_v52 = vcombine.high %v2244_v6, %v3615_v27  ;;  %v1987_v19 = vrot.slane %v1973_v2, %v3685_v31 }
 0x269   :  { %3089 = vrot.lane.b32.xlu1 %v1925_v44, %s3638_s2 }
 0x26a   :  { %v2950_v55 = vpop.permute.xlu0 %2949 }
 0x26b   :  { %v3452_v41 = vsel %vm5432_vm7, %v3451_v24, %v2950_v55  ;;  %v2954_v48 = vpop.permute.xlu1 %2953  ;;  %vm5436_vm7 = vcmask 752640   ;;  %v2251_v55 = vrot.slane %v2237_v43, %v3685_v31 }
 0x26c   :  { %v3453_v34 = vsel %vm5433_vm8, %v3452_v41, %v2954_v48  ;;  %3213 = vrot.lane.b32.xlu0 %v2189_v47, %s3638_s2  ;;  %vm5437_vm8 = vcmask 785408   ;;  %v1991_v48 = vcombine.high %v1987_v19, %v3615_v27 }
 0x26d   :  { %3093 = vrot.lane.b32.xlu1 %v1964_v29, %s5296_s29  ;;  %v2255_v60 = vcombine.high %v2251_v55, %v3615_v27 }
 0x26e   :  { %v2958_v56 = vpop.permute.xlu0 %2957 }
 0x26f   :  { %v3454_v18 = vsel %vm5434_vm9, %v3453_v34, %v2958_v56  ;;  %v2962_v35 = vpop.permute.xlu1 %2961  ;;  %vm5439_vm9 = vcmask 818176  }
 0x270   :  { %v3455_v62 = vsel %vm5435_vm6, %v3454_v18, %v2962_v35  ;;  %3217 = vrot.lane.b32.xlu0 %v2228_v23, %s5296_s29  ;;  %vm5441_vm6 = vcmask 228352  }
 0x271   :  { %3097 = vrot.lane.b32.xlu1 %v1988_v12, %s3640_s4 }
 0x272   :  { %v2966_v61 = vpop.permute.xlu0 %2965 }
 0x273   :  { %v3456_v40 = vsel %vm5436_vm7, %v3455_v62, %v2966_v61  ;;  %v2970_v8 = vpop.permute.xlu1 %2969  ;;  %vm5442_vm7 = vcmask 261120  }
 0x274   :  { %v3457_v21 = vsel %vm5437_vm8, %v3456_v40, %v2970_v8  ;;  %3221 = vrot.lane.b32.xlu0 %v2252_v51, %s3640_s4  ;;  %vm5443_vm8 = vcmask 293888  }
 0x275   :  { %3101 = vrot.lane.b32.xlu1 %v1971_v10, %s5438_s0 }
 0x276   :  { %v2974_v30 = vpop.permute.xlu0 %2973 }
 0x277   :  { %v3458_v37 = vsel %vm5439_vm9, %v3457_v21, %v2974_v30  ;;  %v2978_v9 = vpop.permute.xlu1 %2977  ;;  %vm5444_vm9 = vcmask 326656  }
 0x278   :  { %v3459_v22 = vsel %vm3298_vm13, %v3458_v37, %v2978_v9  ;;  %3225 = vrot.lane.b32.xlu0 %v2235_v25, %s5438_s0 }
 0x279   :  { %3105 = vrot.lane.b32.xlu1 %v1989_v57, %s5440_s10 }
 0x27a   :  { %v2982_v13 = vpop.permute.xlu0 %2981 }
 0x27b   :  { %v3460_v38 = vsel %vm3300_vm14, %v3459_v22, %v2982_v13  ;;  %v2986_v45 = vpop.permute.xlu1 %2985 }
 0x27c   :  { %v3461_v15 = vsel %vm3302_vm12, %v3460_v38, %v2986_v45  ;;  %3229 = vrot.lane.b32.xlu0 %v2253_v36, %s5440_s10 }
 0x27d   :  { %3109 = vrot.lane.b32.xlu1 %v1980_v0, %s5277_s3 }
 0x27e   :  { %v2990_v3 = vpop.permute.xlu0 %2989 }
 0x27f   :  { %v3462_v32 = vsel %vm5257_vm10, %v3461_v15, %v2990_v3  ;;  %v2994_v5 = vpop.permute.xlu1 %2993  ;;  %vm5447_vm10 = vcmask 424960  }
 0x280   :  { %v3463_v58 = vsel %vm5256_vm15, %v3462_v32, %v2994_v5  ;;  %3233 = vrot.lane.b32.xlu0 %v2244_v6, %s5277_s3  ;;  %vm5446_vm15 = vcmask 392192  }
 0x281   :  { %3113 = vrot.lane.b32.xlu1 %v1990_v42, %s3644_s8 }
 0x282   :  { %v2998_v7 = vpop.permute.xlu0 %2997 }
 0x283   :  { %v5112_v59 = vsel %vm5255_vm11, %v3463_v58, %v2998_v7  ;;  %v3002_v50 = vpop.permute.xlu1 %3001  ;;  %vm5445_vm11 = vcmask 359424  }
 0x284   :  { %v3552_v44 = vcombine.low %v4979_v4, %v5112_v59  ;;  %3237 = vrot.lane.b32.xlu0 %v2254_v52, %s3644_s8  ;;  %v3465_v24 = vsel %vm3248_vm0, %v4849_v49, %v3002_v50 }
 0x285   :  { %3117 = vrot.lane.b32.xlu1 %v1987_v19, %s3645_s9 }
 0x286   :  { %v3006_v16 = vpop.permute.xlu0 %3005 }
 0x287   :  { %v3466_v47 = vsel %vm3250_vm1, %v3465_v24, %v3006_v16  ;;  %v3010_v41 = vpop.permute.xlu1 %3009 }
 0x288   :  { %v3467_v29 = vsel %vm3252_vm2, %v3466_v47, %v3010_v41  ;;  %3241 = vrot.lane.b32.xlu0 %v2251_v55, %s3645_s9 }
 0x289   :  { %3121 = vrot.lane.b32.xlu1 %v1991_v48, %s3646_s7 }
 0x28a   :  { %v3014_v34 = vpop.permute.xlu0 %3013 }
 0x28b   :  { %v3468_v56 = vsel %vm3254_vm3, %v3467_v29, %v3014_v34  ;;  %v3018_v49 = vpop.permute.xlu1 %3017 }
 0x28c   :  { %v3469_v23 = vsel %vm3256_vm4, %v3468_v56, %v3018_v49  ;;  %3245 = vrot.lane.b32.xlu0 %v2255_v60, %s3646_s7 }
 0x28e   :  { %v3022_v31 = vpop.permute.xlu0 %3021 }
 0x28f   :  { %v3470_v54 = vsel %vm3258_vm5, %v3469_v23, %v3022_v31  ;;  %v3026_v1 = vpop.permute.xlu1 %3025 }
 0x290   :  { %v3471_v18 = vsel %vm5441_vm6, %v3470_v54, %v3026_v1  ;;  %vm5448_vm6 = vcmask 457728  }
 0x292   :  { %v3030_v35 = vpop.permute.xlu0 %3029 }
 0x293   :  { %v3472_v12 = vsel %vm5442_vm7, %v3471_v18, %v3030_v35  ;;  %v3034_v62 = vpop.permute.xlu1 %3033  ;;  %vm5449_vm7 = vcmask 490496  }
 0x294   :  { %v3473_v46 = vsel %vm5443_vm8, %v3472_v12, %v3034_v62 }
 0x296   :  { %v3038_v27 = vpop.permute.xlu0 %3037 }
 0x297   :  { %v3474_v20 = vsel %vm5444_vm9, %v3473_v46, %v3038_v27  ;;  %v3042_v33 = vpop.permute.xlu1 %3041 }
 0x298   :  { %v3475_v61 = vsel %vm5445_vm11, %v3474_v20, %v3042_v33 }
 0x29a   :  { %v3046_v51 = vpop.permute.xlu0 %3045 }
 0x29b   :  { %v3476_v39 = vsel %vm5446_vm15, %v3475_v61, %v3046_v51  ;;  %v3050_v26 = vpop.permute.xlu1 %3049 }
 0x29c   :  { %v3477_v40 = vsel %vm5447_vm10, %v3476_v39, %v3050_v26  ;;  %vm5450_vm10 = vcmask 228352  }
 0x29e   :  { %v3054_v8 = vpop.permute.xlu0 %3053 }
 0x29f   :  { %v3478_v10 = vsel %vm5448_vm6, %v3477_v40, %v3054_v8  ;;  %v3058_v21 = vpop.permute.xlu1 %3057 }
 0x2a0   :  { %v3479_v63 = vsel %vm5449_vm7, %v3478_v10, %v3058_v21 }
 0x2a2   :  { %v3126_v14 = vpop.permute.xlu0 %3125 }
 0x2a3   :  { %v3130_v30 = vpop.permute.xlu1 %3129  ;;  %v3496_v50 = vsel %vm3248_vm0, %v4922_v28, %v3126_v14  ;;  %vm5451_vm0 = vcmask 261120  }
 0x2a4   :  { %v3497_v24 = vsel %vm3250_vm1, %v3496_v50, %v3130_v30  ;;  %vm5452_vm1 = vmmov %vm5443_vm8  ;;  %vm5459_vm8 = vcmask 523264  }
 0x2a6   :  { %v3134_v25 = vpop.permute.xlu0 %3133 }
 0x2a7   :  { %v3138_v53 = vpop.permute.xlu1 %3137  ;;  %v3498_v55 = vsel %vm3252_vm2, %v3497_v24, %v3134_v25  ;;  %vm5453_vm2 = vmmov %vm5444_vm9 }
 0x2a8   :  { %v3499_v41 = vsel %vm3254_vm3, %v3498_v55, %v3138_v53  ;;  %vm5454_vm3 = vmmov %vm5445_vm11 }
 0x2a9   :  { %vm5457_vm11 = vmmov %vm5448_vm6  ;;  %vm5461_vm6 = vcmask 556032  }
 0x2aa   :  { %v3142_v37 = vpop.permute.xlu0 %3141  ;;  %vm5460_vm9 = vmmov %vm5459_vm8 }
 0x2ab   :  { %v3146_v9 = vpop.permute.xlu1 %3145  ;;  %v3500_v29 = vsel %vm3256_vm4, %v3499_v41, %v3142_v37  ;;  %vm5455_vm4 = vmmov %vm5446_vm15 }
 0x2ac   :  { %v3501_v60 = vsel %vm3258_vm5, %v3500_v29, %v3146_v9  ;;  %vm5456_vm5 = vcmask 424960   ;;  %vm5458_vm15 = vmmov %vm5449_vm7 }
 0x2ad   :  { %vm5462_vm7 = vmmov %vm5461_vm6 }
 0x2ae   :  { %v3150_v57 = vpop.permute.xlu0 %3149 }
 0x2af   :  { %v3154_v22 = vpop.permute.xlu1 %3153  ;;  %v3502_v49 = vsel %vm5450_vm10, %v3501_v60, %v3150_v57  ;;  %vm5463_vm10 = vcmask 588800   ;;  %v3560_v60 = vrot.slane %v3552_v44, %v3671_v17 }
 0x2b0   :  { %v3503_v28 = vsel %vm5451_vm0, %v3502_v49, %v3154_v22  ;;  %vm5464_vm0 = vmmov %vm5463_vm10 }
 0x2b2   :  { %v3158_v11 = vpop.permute.xlu0 %3157 }
 0x2b3   :  { %v3162_v13 = vpop.permute.xlu1 %3161  ;;  %v3504_v54 = vsel %vm5452_vm1, %v3503_v28, %v3158_v11  ;;  %vm5465_vm1 = vcmask 621568  }
 0x2b4   :  { %v3505_v18 = vsel %vm5453_vm2, %v3504_v54, %v3162_v13  ;;  %vm5466_vm2 = vmmov %vm5465_vm1 }
 0x2b6   :  { %v3166_v36 = vpop.permute.xlu0 %3165 }
 0x2b7   :  { %v3170_v38 = vpop.permute.xlu1 %3169  ;;  %v3506_v12 = vsel %vm5454_vm3, %v3505_v18, %v3166_v36  ;;  %vm5467_vm3 = vcmask 654336  }
 0x2b8   :  { %v3507_v46 = vsel %vm5455_vm4, %v3506_v12, %v3170_v38  ;;  %vm5468_vm4 = vmmov %vm5467_vm3 }
 0x2ba   :  { %v3174_v45 = vpop.permute.xlu0 %3173 }
 0x2bb   :  { %v3178_v0 = vpop.permute.xlu1 %3177  ;;  %v3508_v20 = vsel %vm5456_vm5, %v3507_v46, %v3174_v45  ;;  %vm5469_vm5 = vcmask 687104  }
 0x2bc   :  { %v3509_v61 = vsel %vm5457_vm11, %v3508_v20, %v3178_v0  ;;  %vm5470_vm11 = vmmov %vm5469_vm5 }
 0x2be   :  { %v3182_v15 = vpop.permute.xlu0 %3181 }
 0x2bf   :  { %v3062_v3 = vpop.permute.xlu1 %3061  ;;  %v3510_v39 = vsel %vm5458_vm15, %v3509_v61, %v3182_v15  ;;  %vm5471_vm15 = vcmask 719872  }
 0x2c0   :  { %v3480_v40 = vsel %vm5459_vm8, %v3479_v63, %v3062_v3  ;;  %vm5472_vm8 = vmmov %vm5471_vm15 }
 0x2c2   :  { %v3186_v6 = vpop.permute.xlu0 %3185 }
 0x2c3   :  { %v3066_v2 = vpop.permute.xlu1 %3065  ;;  %v3511_v8 = vsel %vm5460_vm9, %v3510_v39, %v3186_v6  ;;  %vm5473_vm9 = vcmask 752640  }
 0x2c4   :  { %v3481_v10 = vsel %vm5461_vm6, %v3480_v40, %v3066_v2  ;;  %vm5474_vm6 = vmmov %vm5473_vm9 }
 0x2c6   :  { %v3190_v32 = vpop.permute.xlu0 %3189 }
 0x2c7   :  { %v3070_v5 = vpop.permute.xlu1 %3069  ;;  %v3512_v21 = vsel %vm5462_vm7, %v3511_v8, %v3190_v32  ;;  %vm5475_vm7 = vcmask 785408  }
 0x2c8   :  { %v3482_v14 = vsel %vm5463_vm10, %v3481_v10, %v3070_v5  ;;  %vm5476_vm10 = vmmov %vm5475_vm7 }
 0x2ca   :  { %v3194_v42 = vpop.permute.xlu0 %3193 }
 0x2cb   :  { %v3074_v58 = vpop.permute.xlu1 %3073  ;;  %v3513_v30 = vsel %vm5464_vm0, %v3512_v21, %v3194_v42  ;;  %vm5477_vm0 = vcmask 818176  }
 0x2cc   :  { %v3483_v53 = vsel %vm5465_vm1, %v3482_v14, %v3074_v58  ;;  %vm5478_vm1 = vmmov %vm5477_vm0 }
 0x2ce   :  { %v3198_v43 = vpop.permute.xlu0 %3197 }
 0x2cf   :  { %v3078_v7 = vpop.permute.xlu1 %3077  ;;  %v3514_v37 = vsel %vm5466_vm2, %v3513_v30, %v3198_v43  ;;  %vm5479_vm2 = vcmask 949248  }
 0x2d0   :  { %v3484_v57 = vsel %vm5467_vm3, %v3483_v53, %v3078_v7  ;;  %vm5480_vm3 = vmmov %vm5479_vm2 }
 0x2d2   :  { %v3202_v52 = vpop.permute.xlu0 %3201 }
 0x2d3   :  { %v3082_v19 = vpop.permute.xlu1 %3081  ;;  %v3515_v63 = vsel %vm5468_vm4, %v3514_v37, %v3202_v52  ;;  %vm5481_vm4 = vcmask 982016  }
 0x2d4   :  { %v3485_v22 = vsel %vm5469_vm5, %v3484_v57, %v3082_v19  ;;  %vm5482_vm5 = vmmov %vm5481_vm4 }
 0x2d6   :  { %v3206_v16 = vpop.permute.xlu0 %3205 }
 0x2d7   :  { %v3086_v47 = vpop.permute.xlu1 %3085  ;;  %v3516_v11 = vsel %vm5470_vm11, %v3515_v63, %v3206_v16 }
 0x2d8   :  { %v3486_v13 = vsel %vm5471_vm15, %v3485_v22, %v3086_v47 }
 0x2da   :  { %v3210_v48 = vpop.permute.xlu0 %3209 }
 0x2db   :  { %v3090_v34 = vpop.permute.xlu1 %3089  ;;  %v3517_v36 = vsel %vm5472_vm8, %v3516_v11, %v3210_v48 }
 0x2dc   :  { %v3487_v45 = vsel %vm5473_vm9, %v3486_v13, %v3090_v34 }
 0x2de   :  { %v3214_v56 = vpop.permute.xlu0 %3213 }
 0x2df   :  { %v3094_v23 = vpop.permute.xlu1 %3093  ;;  %v3518_v0 = vsel %vm5474_vm6, %v3517_v36, %v3214_v56 }
 0x2e0   :  { %v3488_v3 = vsel %vm5475_vm7, %v3487_v45, %v3094_v23 }
 0x2e2   :  { %v3218_v31 = vpop.permute.xlu0 %3217 }
 0x2e3   :  { %v3098_v1 = vpop.permute.xlu1 %3097  ;;  %v3519_v6 = vsel %vm5476_vm10, %v3518_v0, %v3218_v31 }
 0x2e4   :  { %v3489_v2 = vsel %vm5477_vm0, %v3488_v3, %v3098_v1 }
 0x2e6   :  { %v3222_v35 = vpop.permute.xlu0 %3221 }
 0x2e7   :  { %v3102_v62 = vpop.permute.xlu1 %3101  ;;  %v3520_v32 = vsel %vm5478_vm1, %v3519_v6, %v3222_v35 }
 0x2e8   :  { %v3490_v5 = vsel %vm3298_vm13, %v3489_v2, %v3102_v62 }
 0x2ea   :  { %v3226_v27 = vpop.permute.xlu0 %3225 }
 0x2eb   :  { %v3106_v33 = vpop.permute.xlu1 %3105  ;;  %v3521_v42 = vsel %vm3298_vm13, %v3520_v32, %v3226_v27  ;;  %vm5483_vm13 = vcmask 1014784  }
 0x2ec   :  { %v3491_v43 = vsel %vm3300_vm14, %v3490_v5, %v3106_v33  ;;  %vm5484_vm11 = vmmov %vm5483_vm13 }
 0x2ee   :  { %v3230_v51 = vpop.permute.xlu0 %3229 }
 0x2ef   :  { %v3110_v26 = vpop.permute.xlu1 %3109  ;;  %v3522_v7 = vsel %vm3300_vm14, %v3521_v42, %v3230_v51 }
 0x2f0   :  { %v3492_v52 = vsel %vm3302_vm12, %v3491_v43, %v3110_v26 }
 0x2f2   :  { %v3234_v25 = vpop.permute.xlu0 %3233 }
 0x2f3   :  { %v3114_v9 = vpop.permute.xlu1 %3113  ;;  %v3523_v50 = vsel %vm3302_vm12, %v3522_v7, %v3234_v25 }
 0x2f4   :  { %v3493_v24 = vsel %vm5479_vm2, %v3492_v52, %v3114_v9 }
 0x2f6   :  { %v3238_v38 = vpop.permute.xlu0 %3237 }
 0x2f7   :  { %v3118_v15 = vpop.permute.xlu1 %3117  ;;  %v3524_v16 = vsel %vm5480_vm3, %v3523_v50, %v3238_v38 }
 0x2f8   :  { %v3494_v55 = vsel %vm5481_vm4, %v3493_v24, %v3118_v15 }
 0x2fa   :  { %v3242_v58 = vpop.permute.xlu0 %3241 }
 0x2fb   :  { %v3122_v19 = vpop.permute.xlu1 %3121  ;;  %v3525_v47 = vsel %vm5482_vm5, %v3524_v16, %v3242_v58 }
 0x2fc   :  { %v3495_v48 = vsel %vm5483_vm13, %v3494_v55, %v3122_v19 }
 0x2fe   :  { %v3246_v41 = vpop.permute.xlu0 %3245 }
 0x2ff   :  { %v3526_v29 = vsel %vm5484_vm11, %v3525_v47, %v3246_v41 }
 0x300   :  { %v3553_v34 = vcombine.low %v3495_v48, %v3526_v29 }
 0x302   :  { %v3567_v56 = vrot.slane %v3553_v34, %v3671_v17 }
 0x304   :  { %v3568_v49 = vcombine.low %v3560_v60, %v3567_v56 }
 0x306   :  { %3572 = vst [vmem:[%s5198_s1 + $0x8] sm:$0xff] %v3568_v49 }

</bundles_post_ra>
